<compile_context>
chip_gen: v6e
topology: v6e:2x2x1
jax: 0.10.0
libtpu: 0.0.40
codegen_flags: <defaults>
</compile_context>

<pallas_src>
import jax
import jax.numpy as jnp
from jax.experimental import pallas as pl
from jax.experimental.pallas import tpu as pltpu

LEAKY_SLOPE = 0.1   # nn.LeakyReLU(0.1) in the reference module
BN_EPS = 1e-5


def _round_up(x, m):
    return ((x + m - 1) // m) * m


# ---------------------------------------------------------------------------
# Pallas kernel: fused Conv2d (one MXU matmul) + BatchNorm(eval) shift
#                + MaxPool2d(3,3) + LeakyReLU(0.1).  Single grid step.
# ---------------------------------------------------------------------------
def _conv_bn_pool_lrelu_kernel(p_ref, w_ref, s_ref, o_ref):
    # p_ref: (Kp, 9*Mp) bf16  -- im2col patches; lane index = (pool_offset, m),
    #        m = (n, hp, wp); K = (cin, kh, kw), BN scale folded into w.
    # w_ref: (Coutp, Kp) bf16 -- conv weight with BN scale folded in
    # s_ref: (Coutp, 1)  f32  -- folded conv-bias / BN shift
    # o_ref: (Coutp, Mp) bf16 -- pooled, activated output (lane-dense)
    tm = o_ref.shape[1]
    groups = p_ref.shape[1] // tm                    # 3x3 pool window -> 9
    # One long MXU stream instead of 9 short fills/drains (review item).
    acc = jnp.dot(w_ref[...], p_ref[...], preferred_element_type=jnp.float32)
    # Max-reduce the pooling-window groups via 128-aligned static lane slices
    # (Mp is a multiple of 128, so every slice is tile aligned; no reshape).
    m = acc[:, :tm]
    for g in range(1, groups):
        m = jnp.maximum(m, acc[:, g * tm:(g + 1) * tm])
    y = m + s_ref[...]                               # shift commutes with max
    o_ref[...] = jnp.where(y >= 0, y, LEAKY_SLOPE * y).astype(o_ref.dtype)


# ---------------------------------------------------------------------------
# Wrapper: one fused pallas_call per big conv stage (stages 1 and 2)
# ---------------------------------------------------------------------------
def conv_bn_pool_lrelu(act_cnhw, layer):
    """(Cin, N, H, W) bf16 -> (Cout, N, Hp, Wp) bf16 in a single pallas_call."""
    k, pad, cout = layer["k"], layer["pad"], layer["cout"]
    w, shift = layer["w"], layer["shift"]            # (Coutp, Kp) bf16, (Coutp,1) f32
    Coutp, Kp = w.shape

    C, N, H, W = act_cnhw.shape
    Ho, Wo = H + 2 * pad - k + 1, W + 2 * pad - k + 1
    Hp, Wp = Ho // 3, Wo // 3                        # MaxPool2d(3, 3), floor mode
    M = N * Hp * Wp
    Mp = _round_up(M, 128)                           # lane-align; one block over M

    x = act_cnhw
    if pad:
        x = jnp.pad(x, ((0, 0), (0, 0), (pad, pad), (pad, pad)))

    # Pool-grouped, K-major im2col from strided slices (no 7-D transpose):
    #   p[(ci,dh,dw), (i,j), (n,hp,wp)] = x[ci, n, 3*hp + i + dh, 3*wp + j + dw]
    blocks = []
    for dh in range(k):
        for dw in range(k):
            for i in range(3):
                for j in range(3):
                    hs, ws = i + dh, j + dw
                    blocks.append(
                        x[:, :, hs:hs + 3 * (Hp - 1) + 1:3,
                          ws:ws + 3 * (Wp - 1) + 1:3])   # (C, N, Hp, Wp)
    p = jnp.stack(blocks, axis=1)                    # (C, k*k*9, N, Hp, Wp)
    p = p.reshape(C * k * k, 9, M)                   # K-major, pool-offset, m
    p = jnp.pad(p, ((0, Kp - C * k * k), (0, 0), (0, Mp - M)))
    p = p.reshape(Kp, 9 * Mp)                        # bf16

    # VMEM sizing rule (review): 2*patch + acc(f32) + 2*out must stay well under
    # the scoped budget (~3 MiB at batch 2 vs the 32 MiB requested below); the
    # patch block grows ~ (Kp*9*2B)*Hp*Wp per extra image.
    patch_bytes = Kp * 9 * Mp * 2
    cost = pl.CostEstimate(
        flops=2 * Coutp * Kp * 9 * Mp,
        transcendentals=0,
        bytes_accessed=patch_bytes + Coutp * Kp * 2 + Coutp * Mp * 2)

    out = pl.pallas_call(
        _conv_bn_pool_lrelu_kernel,
        out_shape=jax.ShapeDtypeStruct((Coutp, Mp), jnp.bfloat16),
        grid=(1,),                                   # single sequential step
        in_specs=[
            pl.BlockSpec((Kp, 9 * Mp), lambda i: (0, 0)),
            pl.BlockSpec((Coutp, Kp), lambda i: (0, 0)),
            pl.BlockSpec((Coutp, 1), lambda i: (0, 0)),
        ],
        out_specs=pl.BlockSpec((Coutp, Mp), lambda i: (0, 0)),
        compiler_params=pltpu.CompilerParams(vmem_limit_bytes=32 * 1024 * 1024),
        cost_estimate=cost,
    )(p, w, shift)

    out = out[:cout, :M]                             # drop channel / M padding
    return out.reshape(cout, N, Hp, Wp)


# ---------------------------------------------------------------------------
# Parameter init (matches the PyTorch module's init, eval-mode BatchNorm)
# ---------------------------------------------------------------------------
def _new_size(dims, kernel, padding, stride):
    return ((dims[0] - kernel + 2 * padding) // stride + 1,
            (dims[1] - kernel + 2 * padding) // stride + 1)


def init_params(key, number_of_classes=7, in_channel=3, image_size=(72, 96)):
    conv_cfg = [  # (cin, cout, kernel, padding)
        (in_channel, 4, 3, 1),
        (4, 8, 3, 0),
        (8, 16, 5, 0),
    ]
    keys = jax.random.split(key, 5)
    convs, conv3 = [], None
    dims = image_size
    for li, (cin, cout, k, pad) in enumerate(conv_cfg):
        fan_in = cin * k * k
        w = jax.random.normal(keys[li], (cout, cin, k, k), jnp.float32) * jnp.sqrt(
            2.0 / fan_in)                             # kaiming_normal_
        bias = jnp.zeros((cout,), jnp.float32)        # constant_(bias, 0)
        # BatchNorm2d eval-mode (fresh module): gamma=1, beta=0, mean=0, var=1
        gamma = jnp.ones((cout,), jnp.float32)
        beta = jnp.zeros((cout,), jnp.float32)
        r_mean = jnp.zeros((cout,), jnp.float32)
        r_var = jnp.ones((cout,), jnp.float32)
        scale = gamma / jnp.sqrt(r_var + BN_EPS)
        shift = (bias - r_mean) * scale + beta
        if li < 2:
            # Pallas stages: fold BN scale into the (cout, cin*k*k) weight matrix
            # (K order = (ci, kh, kw), matching PyTorch) and pad for bf16 tiling.
            w_mat = w.reshape(cout, fan_in) * scale[:, None]
            Kp = _round_up(fan_in, 16)
            Coutp = _round_up(cout, 16)
            w_p = jnp.zeros((Coutp, Kp), jnp.float32).at[:cout, :fan_in].set(w_mat)
            s_p = jnp.zeros((Coutp, 1), jnp.float32).at[:cout, 0].set(shift)
            convs.append(dict(w=w_p.astype(jnp.bfloat16), shift=s_p,
                              k=k, pad=pad, cout=cout))
        else:
            # Stage 3 stays in XLA (tiny); keep OIHW weights with BN scale folded.
            conv3 = dict(w=w * scale[:, None, None, None], shift=shift)
        dims = _new_size(dims, k, pad, 1)   # conv
        dims = _new_size(dims, 3, 0, 3)     # maxpool(3, 3)
    in_features = dims[0] * dims[1] * 16
    bound = 1.0 / jnp.sqrt(jnp.float32(in_features))
    fc_w = jax.random.uniform(keys[3], (in_features, number_of_classes),
                              jnp.float32, -bound, bound)
    fc_b = jax.random.uniform(keys[4], (number_of_classes,),
                              jnp.float32, -bound, bound)
    return dict(convs=convs, conv3=conv3, fc_w=fc_w, fc_b=fc_b)


# ---------------------------------------------------------------------------
# Forward
# ---------------------------------------------------------------------------
def skin_cancer_forward(x_nchw, params):
    # Channel-first bf16 activations between stages: the kernel's (Cout, M)
    # bf16 output feeds the next stage's patch prep with no cast/transpose.
    a = jnp.transpose(x_nchw, (1, 0, 2, 3)).astype(jnp.bfloat16)   # (C, N, H, W)
    for layer in params["convs"]:                                   # stages 1 & 2
        a = conv_bn_pool_lrelu(a, layer)
        # Dropout: identity in eval mode.
        # TODO(synk): train-mode dropout (stochastic masking) not reproduced.
    # Stage 3 (M=4, ~0.23 MFLOP) + the 32x7 Linear in plain XLA per the review:
    # a pallas_call launch + ~1 MB of >99%-zero patch DMA >> the compute.
    c3 = params["conv3"]
    x3 = jnp.transpose(a, (1, 0, 2, 3)).astype(jnp.float32)         # (N, C, H, W)
    y = jax.lax.conv_general_dilated(
        x3, c3["w"], window_strides=(1, 1), padding="VALID",
        dimension_numbers=("NCHW", "OIHW", "NCHW"))
    y = y + c3["shift"][None, :, None, None]
    n, c, ho, wo = y.shape
    hp, wp = ho // 3, wo // 3
    y = y[:, :, :3 * hp, :3 * wp].reshape(n, c, hp, 3, wp, 3).max(axis=(3, 5))
    y = jnp.where(y >= 0, y, LEAKY_SLOPE * y)
    feat = y.reshape(n, -1)               # PyTorch view(N, -1): (c, hp, wp) order
    return feat @ params["fc_w"] + params["fc_b"]


if __name__ == "__main__":
    key = jax.random.PRNGKey(0)
    pkey, xkey = jax.random.split(key)
    # Small shapes consistent with the module: batch=2, in_channel=3,
    # image_size=(72, 96) keeps all three conv+pool stages valid (final 1x2x16).
    image_size = (72, 96)
    params = init_params(pkey, number_of_classes=7, in_channel=3,
                         image_size=image_size)
    x = jax.random.normal(xkey, (2, 3, image_size[0], image_size[1]), jnp.float32)

    fwd = jax.jit(lambda a: skin_cancer_forward(a, params))
    logits = jax.block_until_ready(fwd(x))

    assert logits.shape == (2, 7), logits.shape
    assert bool(jnp.all(jnp.isfinite(logits)))
    print("KERNEL_OK")
</pallas_src>

<mosaic_0001>
module attributes {stable_mosaic.version = 11 : i64} {
  func.func @_conv_bn_pool_lrelu_kernel(%arg0: i32, %arg1: memref<32x13824xbf16, #tpu.memory_space<vmem>>, %arg2: memref<16x32xbf16, #tpu.memory_space<vmem>>, %arg3: memref<16x1xf32, #tpu.memory_space<vmem>>, %arg4: memref<16x1536xbf16, #tpu.memory_space<vmem>>) attributes {dimension_semantics = [#tpu.dimension_semantics<arbitrary>], iteration_bounds = array<i64: 1>, scalar_prefetch = 0 : i64, scratch_operands = 0 : i64, tpu.core_type = #tpu.core_type<tc>, window_params = [{pipeline_mode = #tpu.pipeline_mode<synchronous>, transform_indices = @transform_0, window_bounds = array<i64: 32, 13824>}, {pipeline_mode = #tpu.pipeline_mode<synchronous>, transform_indices = @transform_1, window_bounds = array<i64: 16, 32>}, {pipeline_mode = #tpu.pipeline_mode<synchronous>, transform_indices = @transform_2, window_bounds = array<i64: 16, 1>}, {pipeline_mode = #tpu.pipeline_mode<synchronous>, transform_indices = @transform_3, window_bounds = array<i64: 16, 1536>}]} {
    %c0 = arith.constant 0 : index
    %c0_0 = arith.constant 0 : index
    %0 = vector.load %arg2[%c0, %c0_0] : memref<16x32xbf16, #tpu.memory_space<vmem>>, vector<16x32xbf16>
    %c0_1 = arith.constant 0 : index
    %c0_2 = arith.constant 0 : index
    %1 = vector.load %arg1[%c0_1, %c0_2] : memref<32x13824xbf16, #tpu.memory_space<vmem>>, vector<32x13824xbf16>
    %cst = arith.constant dense<0.000000e+00> : vector<16x13824xf32>
    %2 = tpu.matmul %0, %1, %cst {dimension_numbers = #tpu.dot_dimension_numbers<[1], [0], [0], [1], [0, 0, 1, 1], [], []>} : vector<16x32xbf16>, vector<32x13824xbf16>, vector<16x13824xf32> -> vector<16x13824xf32>
    %3 = vector.extract_strided_slice %2 {offsets = [0, 0], sizes = [16, 1536], strides = [1, 1]} : vector<16x13824xf32> to vector<16x1536xf32>
    %4 = vector.extract_strided_slice %2 {offsets = [0, 1536], sizes = [16, 1536], strides = [1, 1]} : vector<16x13824xf32> to vector<16x1536xf32>
    %5 = arith.maximumf %3, %4 : vector<16x1536xf32>
    %6 = vector.extract_strided_slice %2 {offsets = [0, 3072], sizes = [16, 1536], strides = [1, 1]} : vector<16x13824xf32> to vector<16x1536xf32>
    %7 = arith.maximumf %5, %6 : vector<16x1536xf32>
    %8 = vector.extract_strided_slice %2 {offsets = [0, 4608], sizes = [16, 1536], strides = [1, 1]} : vector<16x13824xf32> to vector<16x1536xf32>
    %9 = arith.maximumf %7, %8 : vector<16x1536xf32>
    %10 = vector.extract_strided_slice %2 {offsets = [0, 6144], sizes = [16, 1536], strides = [1, 1]} : vector<16x13824xf32> to vector<16x1536xf32>
    %11 = arith.maximumf %9, %10 : vector<16x1536xf32>
    %12 = vector.extract_strided_slice %2 {offsets = [0, 7680], sizes = [16, 1536], strides = [1, 1]} : vector<16x13824xf32> to vector<16x1536xf32>
    %13 = arith.maximumf %11, %12 : vector<16x1536xf32>
    %14 = vector.extract_strided_slice %2 {offsets = [0, 9216], sizes = [16, 1536], strides = [1, 1]} : vector<16x13824xf32> to vector<16x1536xf32>
    %15 = arith.maximumf %13, %14 : vector<16x1536xf32>
    %16 = vector.extract_strided_slice %2 {offsets = [0, 10752], sizes = [16, 1536], strides = [1, 1]} : vector<16x13824xf32> to vector<16x1536xf32>
    %17 = arith.maximumf %15, %16 : vector<16x1536xf32>
    %18 = vector.extract_strided_slice %2 {offsets = [0, 12288], sizes = [16, 1536], strides = [1, 1]} : vector<16x13824xf32> to vector<16x1536xf32>
    %19 = arith.maximumf %17, %18 : vector<16x1536xf32>
    %c0_3 = arith.constant 0 : index
    %c0_4 = arith.constant 0 : index
    %20 = vector.load %arg3[%c0_3, %c0_4] : memref<16x1xf32, #tpu.memory_space<vmem>>, vector<16x1xf32>
    %21 = vector.broadcast %20 : vector<16x1xf32> to vector<16x1536xf32>
    %22 = arith.addf %19, %21 : vector<16x1536xf32>
    %cst_5 = arith.constant 0.000000e+00 : f32
    %23 = vector.broadcast %cst_5 : f32 to vector<16x1536xf32>
    %24 = arith.cmpf oge, %22, %23 : vector<16x1536xf32>
    %cst_6 = arith.constant 1.000000e-01 : f32
    %25 = vector.broadcast %cst_6 : f32 to vector<16x1536xf32>
    %26 = arith.mulf %25, %22 : vector<16x1536xf32>
    %27 = arith.select %24, %22, %26 : vector<16x1536xi1>, vector<16x1536xf32>
    %28 = arith.truncf %27 : vector<16x1536xf32> to vector<16x1536xbf16>
    %c0_7 = arith.constant 0 : index
    %c0_8 = arith.constant 0 : index
    %29 = vector.load %arg4[%c0_7, %c0_8] : memref<16x1536xbf16, #tpu.memory_space<vmem>>, vector<16x1536xbf16>
    tpu.vector_store %arg4[%c0_7, %c0_8], %28 {strides = array<i32>} : memref<16x1536xbf16, #tpu.memory_space<vmem>>, vector<16x1536xbf16>,
    return
  }
  func.func @transform_0(%arg0: i32) -> (i32, i32) {
    %c0_i32 = arith.constant 0 : i32
    %c0_i32_0 = arith.constant 0 : i32
    %c0_i32_1 = arith.constant 0 : i32
    return %c0_i32, %c0_i32_0 : i32, i32
  }
  func.func @transform_1(%arg0: i32) -> (i32, i32) {
    %c0_i32 = arith.constant 0 : i32
    %c0_i32_0 = arith.constant 0 : i32
    %c0_i32_1 = arith.constant 0 : i32
    return %c0_i32, %c0_i32_0 : i32, i32
  }
  func.func @transform_2(%arg0: i32) -> (i32, i32) {
    %c0_i32 = arith.constant 0 : i32
    %c0_i32_0 = arith.constant 0 : i32
    %c0_i32_1 = arith.constant 0 : i32
    return %c0_i32, %c0_i32_0 : i32, i32
  }
  func.func @transform_3(%arg0: i32) -> (i32, i32) {
    %c0_i32 = arith.constant 0 : i32
    %c0_i32_0 = arith.constant 0 : i32
    %c0_i32_1 = arith.constant 0 : i32
    return %c0_i32, %c0_i32_0 : i32, i32
  }
}

module attributes {stable_mosaic.version = 11 : i64} {
  func.func @_conv_bn_pool_lrelu_kernel(%arg0: i32, %arg1: memref<48x2304xbf16, #tpu.memory_space<vmem>>, %arg2: memref<16x48xbf16, #tpu.memory_space<vmem>>, %arg3: memref<16x1xf32, #tpu.memory_space<vmem>>, %arg4: memref<16x256xbf16, #tpu.memory_space<vmem>>) attributes {dimension_semantics = [#tpu.dimension_semantics<arbitrary>], iteration_bounds = array<i64: 1>, scalar_prefetch = 0 : i64, scratch_operands = 0 : i64, tpu.core_type = #tpu.core_type<tc>, window_params = [{pipeline_mode = #tpu.pipeline_mode<synchronous>, transform_indices = @transform_0, window_bounds = array<i64: 48, 2304>}, {pipeline_mode = #tpu.pipeline_mode<synchronous>, transform_indices = @transform_1, window_bounds = array<i64: 16, 48>}, {pipeline_mode = #tpu.pipeline_mode<synchronous>, transform_indices = @transform_2, window_bounds = array<i64: 16, 1>}, {pipeline_mode = #tpu.pipeline_mode<synchronous>, transform_indices = @transform_3, window_bounds = array<i64: 16, 256>}]} {
    %c0 = arith.constant 0 : index
    %c0_0 = arith.constant 0 : index
    %0 = vector.load %arg2[%c0, %c0_0] : memref<16x48xbf16, #tpu.memory_space<vmem>>, vector<16x48xbf16>
    %c0_1 = arith.constant 0 : index
    %c0_2 = arith.constant 0 : index
    %1 = vector.load %arg1[%c0_1, %c0_2] : memref<48x2304xbf16, #tpu.memory_space<vmem>>, vector<48x2304xbf16>
    %cst = arith.constant dense<0.000000e+00> : vector<16x2304xf32>
    %2 = tpu.matmul %0, %1, %cst {dimension_numbers = #tpu.dot_dimension_numbers<[1], [0], [0], [1], [0, 0, 1, 1], [], []>} : vector<16x48xbf16>, vector<48x2304xbf16>, vector<16x2304xf32> -> vector<16x2304xf32>
    %3 = vector.extract_strided_slice %2 {offsets = [0, 0], sizes = [16, 256], strides = [1, 1]} : vector<16x2304xf32> to vector<16x256xf32>
    %4 = vector.extract_strided_slice %2 {offsets = [0, 256], sizes = [16, 256], strides = [1, 1]} : vector<16x2304xf32> to vector<16x256xf32>
    %5 = arith.maximumf %3, %4 : vector<16x256xf32>
    %6 = vector.extract_strided_slice %2 {offsets = [0, 512], sizes = [16, 256], strides = [1, 1]} : vector<16x2304xf32> to vector<16x256xf32>
    %7 = arith.maximumf %5, %6 : vector<16x256xf32>
    %8 = vector.extract_strided_slice %2 {offsets = [0, 768], sizes = [16, 256], strides = [1, 1]} : vector<16x2304xf32> to vector<16x256xf32>
    %9 = arith.maximumf %7, %8 : vector<16x256xf32>
    %10 = vector.extract_strided_slice %2 {offsets = [0, 1024], sizes = [16, 256], strides = [1, 1]} : vector<16x2304xf32> to vector<16x256xf32>
    %11 = arith.maximumf %9, %10 : vector<16x256xf32>
    %12 = vector.extract_strided_slice %2 {offsets = [0, 1280], sizes = [16, 256], strides = [1, 1]} : vector<16x2304xf32> to vector<16x256xf32>
    %13 = arith.maximumf %11, %12 : vector<16x256xf32>
    %14 = vector.extract_strided_slice %2 {offsets = [0, 1536], sizes = [16, 256], strides = [1, 1]} : vector<16x2304xf32> to vector<16x256xf32>
    %15 = arith.maximumf %13, %14 : vector<16x256xf32>
    %16 = vector.extract_strided_slice %2 {offsets = [0, 1792], sizes = [16, 256], strides = [1, 1]} : vector<16x2304xf32> to vector<16x256xf32>
    %17 = arith.maximumf %15, %16 : vector<16x256xf32>
    %18 = vector.extract_strided_slice %2 {offsets = [0, 2048], sizes = [16, 256], strides = [1, 1]} : vector<16x2304xf32> to vector<16x256xf32>
    %19 = arith.maximumf %17, %18 : vector<16x256xf32>
    %c0_3 = arith.constant 0 : index
    %c0_4 = arith.constant 0 : index
    %20 = vector.load %arg3[%c0_3, %c0_4] : memref<16x1xf32, #tpu.memory_space<vmem>>, vector<16x1xf32>
    %21 = vector.broadcast %20 : vector<16x1xf32> to vector<16x256xf32>
    %22 = arith.addf %19, %21 : vector<16x256xf32>
    %cst_5 = arith.constant 0.000000e+00 : f32
    %23 = vector.broadcast %cst_5 : f32 to vector<16x256xf32>
    %24 = arith.cmpf oge, %22, %23 : vector<16x256xf32>
    %cst_6 = arith.constant 1.000000e-01 : f32
    %25 = vector.broadcast %cst_6 : f32 to vector<16x256xf32>
    %26 = arith.mulf %25, %22 : vector<16x256xf32>
    %27 = arith.select %24, %22, %26 : vector<16x256xi1>, vector<16x256xf32>
    %28 = arith.truncf %27 : vector<16x256xf32> to vector<16x256xbf16>
    %c0_7 = arith.constant 0 : index
    %c0_8 = arith.constant 0 : index
    %29 = vector.load %arg4[%c0_7, %c0_8] : memref<16x256xbf16, #tpu.memory_space<vmem>>, vector<16x256xbf16>
    tpu.vector_store %arg4[%c0_7, %c0_8], %28 {strides = array<i32>} : memref<16x256xbf16, #tpu.memory_space<vmem>>, vector<16x256xbf16>,
    return
  }
  func.func @transform_0(%arg0: i32) -> (i32, i32) {
    %c0_i32 = arith.constant 0 : i32
    %c0_i32_0 = arith.constant 0 : i32
    %c0_i32_1 = arith.constant 0 : i32
    return %c0_i32, %c0_i32_0 : i32, i32
  }
  func.func @transform_1(%arg0: i32) -> (i32, i32) {
    %c0_i32 = arith.constant 0 : i32
    %c0_i32_0 = arith.constant 0 : i32
    %c0_i32_1 = arith.constant 0 : i32
    return %c0_i32, %c0_i32_0 : i32, i32
  }
  func.func @transform_2(%arg0: i32) -> (i32, i32) {
    %c0_i32 = arith.constant 0 : i32
    %c0_i32_0 = arith.constant 0 : i32
    %c0_i32_1 = arith.constant 0 : i32
    return %c0_i32, %c0_i32_0 : i32, i32
  }
  func.func @transform_3(%arg0: i32) -> (i32, i32) {
    %c0_i32 = arith.constant 0 : i32
    %c0_i32_0 = arith.constant 0 : i32
    %c0_i32_1 = arith.constant 0 : i32
    return %c0_i32, %c0_i32_0 : i32, i32
  }
}

</mosaic_0001>

<bundles_post_ra>
// kernel: _lambda_.2
= control target key start
LH: loop header
LB: loop body
LE: loop exit
PB: predicated region body
PF: predicated region fallthrough
CT: control target
= control target key end

     0   :  { %v4655_v1 = vmov 0   ;;  %vm1318_vm0 = vcmask 261120   ;;  %s6101_s0 = inlined_call_operand.vmem [shape: bf16[32,13824], index: 0, kind: input, shape index: {}]   ;;  %s6102_s1 = inlined_call_operand.vmem [shape: bf16[16,32], index: 1, kind: input, shape index: {}]   ;;  %s6103_s2 = inlined_call_operand.vmem [shape: f32[16,1], index: 2, kind: input, shape index: {}]   ;;  %s6104_s3 = inlined_call_operand.vmem [shape: bf16[16,1536], index: 3, kind: output, shape index: {}]  }
   0x1   :  { %v4329_v0 = vld [vmem:[%s6101_s0 + $0x364] ss:$432 sps:$4 sm:$0xff]   ;;  %1354 = vmatprep.mubr.bf16.mxu0 %v4655_v1  ;;  %1397 = vmatprep.mubr.bf16.mxu1 %v4655_v1  ;;  %v4331_v2 = vld [vmem:[%s6101_s0 + $0x36c] ss:$432 sps:$4 sm:$0xff]   ;;  %v4333_v3 = vld [vmem:[%s6101_s0 + $0x360] ss:$432 sps:$4 sm:$0xff]  }
   0x2   :  { %4328 = vset.pattern.permute.xlu0 %v4655_v1  ;;  %1334 = vmatprep.subr.bf16.mxu0 %v4329_v0  ;;  %v4334_v4 = vld [vmem:[%s6101_s0 + $0x368] ss:$432 sps:$4 sm:$0xff]   ;;  %v4335_v5 = vld [vmem:[%s6101_s0 + $0x4] ss:$432 sps:$4 sm:$0xff]   ;;  %v4337_v6 = vld [vmem:[%s6101_s0 + $0xc] ss:$432 sps:$4 sm:$0xff]  }
   0x3   :  { %1377 = vmatprep.subr.bf16.mxu1 %v4331_v2  ;;  %1335 = vmatpush1.bf16.msra.mxu0 %v4333_v3  ;;  %v4339_v7 = vld [vmem:[%s6101_s0] ss:$432 sps:$4 sm:$0xff]   ;;  %v4340_v8 = vld [vmem:[%s6101_s0 + $0x8] ss:$432 sps:$4 sm:$0xff]   ;;  %v4344_v11 = vld [vmem:[%s6101_s0 + $0x374] ss:$432 sps:$4 sm:$0xff]  }
   0x4   :  { %1378 = vmatpush1.bf16.msra.mxu1 %v4334_v4  ;;  %1336 = vmatprep.subr.bf16.mxu0 %v4335_v5  ;;  %v4706_v9 = vld [vmem:[%s6102_s1] sm:$0xff]   ;;  %v4345_v12 = vld [vmem:[%s6101_s0 + $0x378] ss:$432 sps:$4 sm:$0xff]   ;;  %v4347_v13 = vld [vmem:[%s6101_s0 + $0x37c] ss:$432 sps:$4 sm:$0xff]  }
   0x5   :  { %1379 = vmatprep.subr.bf16.mxu1 %v4337_v6  ;;  %v4342_v10 = vld [vmem:[%s6101_s0 + $0x370] ss:$432 sps:$4 sm:$0xff]   ;;  %v4350_v14 = vld [vmem:[%s6101_s0 + $0x14] ss:$432 sps:$4 sm:$0xff]   ;;  %v4353_v15 = vld [vmem:[%s6101_s0 + $0x1c] ss:$432 sps:$4 sm:$0xff]  }
   0x6   :  { %v4348_v16 = vld [vmem:[%s6101_s0 + $0x10] ss:$432 sps:$4 sm:$0xff]   ;;  %v4351_v17 = vld [vmem:[%s6101_s0 + $0x18] ss:$432 sps:$4 sm:$0xff]   ;;  %v4356_v18 = vld [vmem:[%s6101_s0 + $0x384] ss:$432 sps:$4 sm:$0xff]  }
   0x7   :  { %1337 = vmatpush1.bf16.msra.mxu0 %v4339_v7  ;;  %v4359_v19 = vld [vmem:[%s6101_s0 + $0x38c] ss:$432 sps:$4 sm:$0xff]   ;;  %v4354_v20 = vld [vmem:[%s6101_s0 + $0x380] ss:$432 sps:$4 sm:$0xff]   ;;  %v4357_v21 = vld [vmem:[%s6101_s0 + $0x388] ss:$432 sps:$4 sm:$0xff]  }
   0x8   :  { %1380 = vmatpush1.bf16.msra.mxu1 %v4340_v8  ;;  %1420 = vmatprep.subr.bf16.mxu0 %v4344_v11  ;;  %v4362_v22 = vld [vmem:[%s6101_s0 + $0x24] ss:$432 sps:$4 sm:$0xff]   ;;  %v4365_v23 = vld [vmem:[%s6101_s0 + $0x2c] ss:$432 sps:$4 sm:$0xff]   ;;  %v4360_v24 = vld [vmem:[%s6101_s0 + $0x20] ss:$432 sps:$4 sm:$0xff]  }
   0x9   :  { %1463 = vmatprep.subr.bf16.mxu1 %v4347_v13  ;;  %v4363_v25 = vld [vmem:[%s6101_s0 + $0x28] ss:$432 sps:$4 sm:$0xff]   ;;  %v4368_v26 = vld [vmem:[%s6101_s0 + $0x394] ss:$432 sps:$4 sm:$0xff]   ;;  %v4371_v27 = vld [vmem:[%s6101_s0 + $0x39c] ss:$432 sps:$4 sm:$0xff]  }
   0xa   :  { %4249 = vmatmul.mubr.msk.bf16.vlgmr.msra.gmra.mxu0 %vm1318_vm0, %v4706_v9  ;;  %v4366_v28 = vld [vmem:[%s6101_s0 + $0x390] ss:$432 sps:$4 sm:$0xff]   ;;  %v4369_v29 = vld [vmem:[%s6101_s0 + $0x398] ss:$432 sps:$4 sm:$0xff]   ;;  %v4374_v30 = vld [vmem:[%s6101_s0 + $0x34] ss:$432 sps:$4 sm:$0xff]  }
   0xb   :  { %4250 = vmatmul.mubr.msk.bf16.vlgmr.msra.gmra.mxu1 %vm1318_vm0, %v4706_v9  ;;  %1421 = vmatpush1.bf16.msra.mxu0 %v4342_v10  ;;  %v4377_v31 = vld [vmem:[%s6101_s0 + $0x3c] ss:$432 sps:$4 sm:$0xff]   ;;  %v4372_v32 = vld [vmem:[%s6101_s0 + $0x30] ss:$432 sps:$4 sm:$0xff]   ;;  %v4375_v33 = vld [vmem:[%s6101_s0 + $0x38] ss:$432 sps:$4 sm:$0xff]  }
   0xc   :  { %1464 = vmatpush1.bf16.msra.mxu1 %v4345_v12  ;;  %1422 = vmatprep.subr.bf16.mxu0 %v4350_v14  ;;  %v4380_v34 = vld [vmem:[%s6101_s0 + $0x3a4] ss:$432 sps:$4 sm:$0xff]   ;;  %v4383_v35 = vld [vmem:[%s6101_s0 + $0x3ac] ss:$432 sps:$4 sm:$0xff]   ;;  %v4378_v36 = vld [vmem:[%s6101_s0 + $0x3a0] ss:$432 sps:$4 sm:$0xff]  }
   0xd   :  { %1465 = vmatprep.subr.bf16.mxu1 %v4353_v15  ;;  %1440 = vmatprep.mubr.bf16.mxu0 %v4655_v1  ;;  %v4381_v37 = vld [vmem:[%s6101_s0 + $0x3a8] ss:$432 sps:$4 sm:$0xff]   ;;  %v4386_v38 = vld [vmem:[%s6101_s0 + $0x44] ss:$432 sps:$4 sm:$0xff]   ;;  %v4389_v39 = vld [vmem:[%s6101_s0 + $0x4c] ss:$432 sps:$4 sm:$0xff]  }
   0xe   :  { %1483 = vmatprep.mubr.bf16.mxu1 %v4655_v1  ;;  %v4384_v40 = vld [vmem:[%s6101_s0 + $0x40] ss:$432 sps:$4 sm:$0xff]   ;;  %v4387_v41 = vld [vmem:[%s6101_s0 + $0x48] ss:$432 sps:$4 sm:$0xff]   ;;  %v4392_v42 = vld [vmem:[%s6101_s0 + $0x3b4] ss:$432 sps:$4 sm:$0xff]  }
   0xf   :  { %1423 = vmatpush1.bf16.msra.mxu0 %v4348_v16  ;;  %v4395_v43 = vld [vmem:[%s6101_s0 + $0x3bc] ss:$432 sps:$4 sm:$0xff]   ;;  %v4390_v44 = vld [vmem:[%s6101_s0 + $0x3b0] ss:$432 sps:$4 sm:$0xff]   ;;  %v4393_v45 = vld [vmem:[%s6101_s0 + $0x3b8] ss:$432 sps:$4 sm:$0xff]  }
  0x10   :  { %1466 = vmatpush1.bf16.msra.mxu1 %v4351_v17  ;;  %1506 = vmatprep.subr.bf16.mxu0 %v4356_v18  ;;  %v4398_v46 = vld [vmem:[%s6101_s0 + $0x54] ss:$432 sps:$4 sm:$0xff]   ;;  %v4401_v47 = vld [vmem:[%s6101_s0 + $0x5c] ss:$432 sps:$4 sm:$0xff]   ;;  %v4396_v48 = vld [vmem:[%s6101_s0 + $0x50] ss:$432 sps:$4 sm:$0xff]  }
  0x11   :  { %1549 = vmatprep.subr.bf16.mxu1 %v4359_v19  ;;  %v4399_v49 = vld [vmem:[%s6101_s0 + $0x58] ss:$432 sps:$4 sm:$0xff]   ;;  %v4404_v50 = vld [vmem:[%s6101_s0 + $0x3c4] ss:$432 sps:$4 sm:$0xff]   ;;  %v4407_v51 = vld [vmem:[%s6101_s0 + $0x3cc] ss:$432 sps:$4 sm:$0xff]  }
  0x12   :  { %4251 = vmatmul.mubr.msk.bf16.vlgmr.msra.gmra.mxu0 %vm1318_vm0, %v4706_v9  ;;  %v4402_v52 = vld [vmem:[%s6101_s0 + $0x3c0] ss:$432 sps:$4 sm:$0xff]   ;;  %v4405_v53 = vld [vmem:[%s6101_s0 + $0x3c8] ss:$432 sps:$4 sm:$0xff]   ;;  %v4410_v54 = vld [vmem:[%s6101_s0 + $0x64] ss:$432 sps:$4 sm:$0xff]  }
  0x13   :  { %4252 = vmatmul.mubr.msk.bf16.vlgmr.msra.gmra.mxu1 %vm1318_vm0, %v4706_v9  ;;  %1507 = vmatpush1.bf16.msra.mxu0 %v4354_v20  ;;  %v4413_v55 = vld [vmem:[%s6101_s0 + $0x6c] ss:$432 sps:$4 sm:$0xff]   ;;  %v4408_v56 = vld [vmem:[%s6101_s0 + $0x60] ss:$432 sps:$4 sm:$0xff]   ;;  %v4411_v57 = vld [vmem:[%s6101_s0 + $0x68] ss:$432 sps:$4 sm:$0xff]  }
  0x14   :  { %1550 = vmatpush1.bf16.msra.mxu1 %v4357_v21  ;;  %1508 = vmatprep.subr.bf16.mxu0 %v4362_v22  ;;  %v4416_v58 = vld [vmem:[%s6101_s0 + $0x3d4] ss:$432 sps:$4 sm:$0xff]   ;;  %v4419_v59 = vld [vmem:[%s6101_s0 + $0x3dc] ss:$432 sps:$4 sm:$0xff]   ;;  %v4414_v60 = vld [vmem:[%s6101_s0 + $0x3d0] ss:$432 sps:$4 sm:$0xff]  }
  0x15   :  { %1551 = vmatprep.subr.bf16.mxu1 %v4365_v23  ;;  %1526 = vmatprep.mubr.bf16.mxu0 %v4655_v1  ;;  %v4417_v61 = vld [vmem:[%s6101_s0 + $0x3d8] ss:$432 sps:$4 sm:$0xff]   ;;  %v4422_v62 = vld [vmem:[%s6101_s0 + $0x74] ss:$432 sps:$4 sm:$0xff]   ;;  %v4425_v63 = vld [vmem:[%s6101_s0 + $0x7c] ss:$432 sps:$4 sm:$0xff]  }
  0x16   :  { %1569 = vmatprep.mubr.bf16.mxu1 %v4655_v1  ;;  %v4420_v0 = vld [vmem:[%s6101_s0 + $0x70] ss:$432 sps:$4 sm:$0xff]   ;;  %v4423_v2 = vld [vmem:[%s6101_s0 + $0x78] ss:$432 sps:$4 sm:$0xff]   ;;  %v4428_v3 = vld [vmem:[%s6101_s0 + $0x3e4] ss:$432 sps:$4 sm:$0xff]  }
  0x17   :  { %1509 = vmatpush1.bf16.msra.mxu0 %v4360_v24  ;;  %v4431_v4 = vld [vmem:[%s6101_s0 + $0x3ec] ss:$432 sps:$4 sm:$0xff]   ;;  %v4426_v5 = vld [vmem:[%s6101_s0 + $0x3e0] ss:$432 sps:$4 sm:$0xff]   ;;  %v4429_v6 = vld [vmem:[%s6101_s0 + $0x3e8] ss:$432 sps:$4 sm:$0xff]  }
  0x18   :  { %1552 = vmatpush1.bf16.msra.mxu1 %v4363_v25  ;;  %1592 = vmatprep.subr.bf16.mxu0 %v4368_v26  ;;  %v4434_v7 = vld [vmem:[%s6101_s0 + $0x84] ss:$432 sps:$4 sm:$0xff]   ;;  %v4437_v8 = vld [vmem:[%s6101_s0 + $0x8c] ss:$432 sps:$4 sm:$0xff]   ;;  %v4432_v10 = vld [vmem:[%s6101_s0 + $0x80] ss:$432 sps:$4 sm:$0xff]  }
  0x19   :  { %1635 = vmatprep.subr.bf16.mxu1 %v4371_v27  ;;  %v4435_v11 = vld [vmem:[%s6101_s0 + $0x88] ss:$432 sps:$4 sm:$0xff]   ;;  %v4440_v12 = vld [vmem:[%s6101_s0 + $0x3f4] ss:$432 sps:$4 sm:$0xff]   ;;  %v4443_v13 = vld [vmem:[%s6101_s0 + $0x3fc] ss:$432 sps:$4 sm:$0xff]  }
  0x1a   :  { %4253 = vmatmul.mubr.msk.bf16.vlgmr.msra.gmra.mxu0 %vm1318_vm0, %v4706_v9  ;;  %v4438_v14 = vld [vmem:[%s6101_s0 + $0x3f0] ss:$432 sps:$4 sm:$0xff]   ;;  %v4441_v15 = vld [vmem:[%s6101_s0 + $0x3f8] ss:$432 sps:$4 sm:$0xff]   ;;  %v4446_v16 = vld [vmem:[%s6101_s0 + $0x94] ss:$432 sps:$4 sm:$0xff]  }
  0x1b   :  { %4254 = vmatmul.mubr.msk.bf16.vlgmr.msra.gmra.mxu1 %vm1318_vm0, %v4706_v9  ;;  %1593 = vmatpush1.bf16.msra.mxu0 %v4366_v28  ;;  %v4449_v17 = vld [vmem:[%s6101_s0 + $0x9c] ss:$432 sps:$4 sm:$0xff]   ;;  %v4444_v18 = vld [vmem:[%s6101_s0 + $0x90] ss:$432 sps:$4 sm:$0xff]   ;;  %v4447_v19 = vld [vmem:[%s6101_s0 + $0x98] ss:$432 sps:$4 sm:$0xff]  }
  0x1c   :  { %1636 = vmatpush1.bf16.msra.mxu1 %v4369_v29  ;;  %1594 = vmatprep.subr.bf16.mxu0 %v4374_v30  ;;  %v4452_v20 = vld [vmem:[%s6101_s0 + $0x404] ss:$432 sps:$4 sm:$0xff]   ;;  %v4455_v21 = vld [vmem:[%s6101_s0 + $0x40c] ss:$432 sps:$4 sm:$0xff]   ;;  %v4450_v22 = vld [vmem:[%s6101_s0 + $0x400] ss:$432 sps:$4 sm:$0xff]  }
  0x1d   :  { %1637 = vmatprep.subr.bf16.mxu1 %v4377_v31  ;;  %1612 = vmatprep.mubr.bf16.mxu0 %v4655_v1  ;;  %v4453_v23 = vld [vmem:[%s6101_s0 + $0x408] ss:$432 sps:$4 sm:$0xff]   ;;  %v4458_v24 = vld [vmem:[%s6101_s0 + $0xa4] ss:$432 sps:$4 sm:$0xff]   ;;  %v4461_v25 = vld [vmem:[%s6101_s0 + $0xac] ss:$432 sps:$4 sm:$0xff]  }
  0x1e   :  { %1655 = vmatprep.mubr.bf16.mxu1 %v4655_v1  ;;  %v4456_v26 = vld [vmem:[%s6101_s0 + $0xa0] ss:$432 sps:$4 sm:$0xff]   ;;  %v4459_v27 = vld [vmem:[%s6101_s0 + $0xa8] ss:$432 sps:$4 sm:$0xff]   ;;  %v4464_v28 = vld [vmem:[%s6101_s0 + $0x414] ss:$432 sps:$4 sm:$0xff]  }
  0x1f   :  { %1595 = vmatpush1.bf16.msra.mxu0 %v4372_v32  ;;  %v4467_v29 = vld [vmem:[%s6101_s0 + $0x41c] ss:$432 sps:$4 sm:$0xff]   ;;  %v4462_v30 = vld [vmem:[%s6101_s0 + $0x410] ss:$432 sps:$4 sm:$0xff]   ;;  %v4465_v31 = vld [vmem:[%s6101_s0 + $0x418] ss:$432 sps:$4 sm:$0xff]  }
  0x20   :  { %1638 = vmatpush1.bf16.msra.mxu1 %v4375_v33  ;;  %1678 = vmatprep.subr.bf16.mxu0 %v4380_v34  ;;  %v4470_v32 = vld [vmem:[%s6101_s0 + $0xb4] ss:$432 sps:$4 sm:$0xff]   ;;  %v4473_v33 = vld [vmem:[%s6101_s0 + $0xbc] ss:$432 sps:$4 sm:$0xff]   ;;  %v4468_v34 = vld [vmem:[%s6101_s0 + $0xb0] ss:$432 sps:$4 sm:$0xff]  }
  0x21   :  { %1721 = vmatprep.subr.bf16.mxu1 %v4383_v35  ;;  %v4471_v35 = vld [vmem:[%s6101_s0 + $0xb8] ss:$432 sps:$4 sm:$0xff]  }
  0x22   :  { %4255 = vmatmul.mubr.msk.bf16.vlgmr.msra.gmra.mxu0 %vm1318_vm0, %v4706_v9 }
  0x23   :  { %4256 = vmatmul.mubr.msk.bf16.vlgmr.msra.gmra.mxu1 %vm1318_vm0, %v4706_v9  ;;  %1679 = vmatpush1.bf16.msra.mxu0 %v4378_v36  ;;  %v4476_v36 = vld [vmem:[%s6101_s0 + $0x424] ss:$432 sps:$4 sm:$0xff]  }
  0x24   :  { %1722 = vmatpush1.bf16.msra.mxu1 %v4381_v37  ;;  %1680 = vmatprep.subr.bf16.mxu0 %v4386_v38  ;;  %v4479_v37 = vld [vmem:[%s6101_s0 + $0x42c] ss:$432 sps:$4 sm:$0xff]   ;;  %v4474_v38 = vld [vmem:[%s6101_s0 + $0x420] ss:$432 sps:$4 sm:$0xff]  }
  0x25   :  { %1723 = vmatprep.subr.bf16.mxu1 %v4389_v39  ;;  %1698 = vmatprep.mubr.bf16.mxu0 %v4655_v1  ;;  %v4477_v39 = vld [vmem:[%s6101_s0 + $0x428] ss:$432 sps:$4 sm:$0xff]  }
  0x26   :  { %1741 = vmatprep.mubr.bf16.mxu1 %v4655_v1 }
  0x27   :  { %1681 = vmatpush1.bf16.msra.mxu0 %v4384_v40  ;;  %v4482_v40 = vld [vmem:[%s6101_s0 + $0xc4] ss:$432 sps:$4 sm:$0xff]  }
  0x28   :  { %1724 = vmatpush1.bf16.msra.mxu1 %v4387_v41  ;;  %1764 = vmatprep.subr.bf16.mxu0 %v4392_v42  ;;  %v4485_v41 = vld [vmem:[%s6101_s0 + $0xcc] ss:$432 sps:$4 sm:$0xff]   ;;  %v4480_v42 = vld [vmem:[%s6101_s0 + $0xc0] ss:$432 sps:$4 sm:$0xff]  }
  0x29   :  { %1807 = vmatprep.subr.bf16.mxu1 %v4395_v43  ;;  %v4483_v43 = vld [vmem:[%s6101_s0 + $0xc8] ss:$432 sps:$4 sm:$0xff]  }
  0x2a   :  { %4257 = vmatmul.mubr.msk.bf16.vlgmr.msra.gmra.mxu0 %vm1318_vm0, %v4706_v9 }
  0x2b   :  { %4258 = vmatmul.mubr.msk.bf16.vlgmr.msra.gmra.mxu1 %vm1318_vm0, %v4706_v9  ;;  %1765 = vmatpush1.bf16.msra.mxu0 %v4390_v44  ;;  %v4488_v44 = vld [vmem:[%s6101_s0 + $0x434] ss:$432 sps:$4 sm:$0xff]  }
  0x2c   :  { %1808 = vmatpush1.bf16.msra.mxu1 %v4393_v45  ;;  %1766 = vmatprep.subr.bf16.mxu0 %v4398_v46  ;;  %v4491_v45 = vld [vmem:[%s6101_s0 + $0x43c] ss:$432 sps:$4 sm:$0xff]   ;;  %v4486_v46 = vld [vmem:[%s6101_s0 + $0x430] ss:$432 sps:$4 sm:$0xff]  }
  0x2d   :  { %1809 = vmatprep.subr.bf16.mxu1 %v4401_v47  ;;  %1784 = vmatprep.mubr.bf16.mxu0 %v4655_v1  ;;  %v4489_v47 = vld [vmem:[%s6101_s0 + $0x438] ss:$432 sps:$4 sm:$0xff]  }
  0x2e   :  { %1827 = vmatprep.mubr.bf16.mxu1 %v4655_v1 }
  0x2f   :  { %1767 = vmatpush1.bf16.msra.mxu0 %v4396_v48  ;;  %v4494_v48 = vld [vmem:[%s6101_s0 + $0xd4] ss:$432 sps:$4 sm:$0xff]  }
  0x30   :  { %1810 = vmatpush1.bf16.msra.mxu1 %v4399_v49  ;;  %1850 = vmatprep.subr.bf16.mxu0 %v4404_v50  ;;  %v4497_v49 = vld [vmem:[%s6101_s0 + $0xdc] ss:$432 sps:$4 sm:$0xff]   ;;  %v4492_v50 = vld [vmem:[%s6101_s0 + $0xd0] ss:$432 sps:$4 sm:$0xff]  }
  0x31   :  { %1893 = vmatprep.subr.bf16.mxu1 %v4407_v51  ;;  %v4495_v51 = vld [vmem:[%s6101_s0 + $0xd8] ss:$432 sps:$4 sm:$0xff]  }
  0x32   :  { %4259 = vmatmul.mubr.msk.bf16.vlgmr.msra.gmra.mxu0 %vm1318_vm0, %v4706_v9 }
  0x33   :  { %4260 = vmatmul.mubr.msk.bf16.vlgmr.msra.gmra.mxu1 %vm1318_vm0, %v4706_v9  ;;  %1851 = vmatpush1.bf16.msra.mxu0 %v4402_v52  ;;  %v4500_v52 = vld [vmem:[%s6101_s0 + $0x444] ss:$432 sps:$4 sm:$0xff]  }
  0x34   :  { %1894 = vmatpush1.bf16.msra.mxu1 %v4405_v53  ;;  %1852 = vmatprep.subr.bf16.mxu0 %v4410_v54  ;;  %v4503_v53 = vld [vmem:[%s6101_s0 + $0x44c] ss:$432 sps:$4 sm:$0xff]   ;;  %v4498_v54 = vld [vmem:[%s6101_s0 + $0x440] ss:$432 sps:$4 sm:$0xff]  }
  0x35   :  { %1895 = vmatprep.subr.bf16.mxu1 %v4413_v55  ;;  %1870 = vmatprep.mubr.bf16.mxu0 %v4655_v1  ;;  %v4501_v55 = vld [vmem:[%s6101_s0 + $0x448] ss:$432 sps:$4 sm:$0xff]  }
  0x36   :  { %1913 = vmatprep.mubr.bf16.mxu1 %v4655_v1 }
  0x37   :  { %1853 = vmatpush1.bf16.msra.mxu0 %v4408_v56  ;;  %v4506_v56 = vld [vmem:[%s6101_s0 + $0xe4] ss:$432 sps:$4 sm:$0xff]  }
  0x38   :  { %1896 = vmatpush1.bf16.msra.mxu1 %v4411_v57  ;;  %1936 = vmatprep.subr.bf16.mxu0 %v4416_v58  ;;  %v4509_v57 = vld [vmem:[%s6101_s0 + $0xec] ss:$432 sps:$4 sm:$0xff]   ;;  %v4504_v58 = vld [vmem:[%s6101_s0 + $0xe0] ss:$432 sps:$4 sm:$0xff]  }
  0x39   :  { %1979 = vmatprep.subr.bf16.mxu1 %v4419_v59  ;;  %v4507_v59 = vld [vmem:[%s6101_s0 + $0xe8] ss:$432 sps:$4 sm:$0xff]  }
  0x3a   :  { %4261 = vmatmul.mubr.msk.bf16.vlgmr.msra.gmra.mxu0 %vm1318_vm0, %v4706_v9 }
  0x3b   :  { %4262 = vmatmul.mubr.msk.bf16.vlgmr.msra.gmra.mxu1 %vm1318_vm0, %v4706_v9  ;;  %1937 = vmatpush1.bf16.msra.mxu0 %v4414_v60  ;;  %v4512_v60 = vld [vmem:[%s6101_s0 + $0x454] ss:$432 sps:$4 sm:$0xff]  }
  0x3c   :  { %1980 = vmatpush1.bf16.msra.mxu1 %v4417_v61  ;;  %1938 = vmatprep.subr.bf16.mxu0 %v4422_v62  ;;  %v4515_v61 = vld [vmem:[%s6101_s0 + $0x45c] ss:$432 sps:$4 sm:$0xff]   ;;  %v4510_v62 = vld [vmem:[%s6101_s0 + $0x450] ss:$432 sps:$4 sm:$0xff]  }
  0x3d   :  { %1981 = vmatprep.subr.bf16.mxu1 %v4425_v63  ;;  %1956 = vmatprep.mubr.bf16.mxu0 %v4655_v1  ;;  %v4513_v63 = vld [vmem:[%s6101_s0 + $0x458] ss:$432 sps:$4 sm:$0xff]  }
  0x3e   :  { %1999 = vmatprep.mubr.bf16.mxu1 %v4655_v1 }
  0x3f   :  { %1939 = vmatpush1.bf16.msra.mxu0 %v4420_v0  ;;  %v4518_v0 = vld [vmem:[%s6101_s0 + $0xf4] ss:$432 sps:$4 sm:$0xff]  }
  0x40   :  { %1982 = vmatpush1.bf16.msra.mxu1 %v4423_v2  ;;  %2022 = vmatprep.subr.bf16.mxu0 %v4428_v3  ;;  %v4521_v2 = vld [vmem:[%s6101_s0 + $0xfc] ss:$432 sps:$4 sm:$0xff]   ;;  %v4516_v3 = vld [vmem:[%s6101_s0 + $0xf0] ss:$432 sps:$4 sm:$0xff]  }
  0x41   :  { %2065 = vmatprep.subr.bf16.mxu1 %v4431_v4  ;;  %v4519_v4 = vld [vmem:[%s6101_s0 + $0xf8] ss:$432 sps:$4 sm:$0xff]  }
  0x42   :  { %4263 = vmatmul.mubr.msk.bf16.vlgmr.msra.gmra.mxu0 %vm1318_vm0, %v4706_v9 }
  0x43   :  { %4264 = vmatmul.mubr.msk.bf16.vlgmr.msra.gmra.mxu1 %vm1318_vm0, %v4706_v9  ;;  %2023 = vmatpush1.bf16.msra.mxu0 %v4426_v5  ;;  %v4524_v5 = vld [vmem:[%s6101_s0 + $0x464] ss:$432 sps:$4 sm:$0xff]  }
  0x44   :  { %2066 = vmatpush1.bf16.msra.mxu1 %v4429_v6  ;;  %2024 = vmatprep.subr.bf16.mxu0 %v4434_v7  ;;  %v4527_v6 = vld [vmem:[%s6101_s0 + $0x46c] ss:$432 sps:$4 sm:$0xff]   ;;  %v4522_v7 = vld [vmem:[%s6101_s0 + $0x460] ss:$432 sps:$4 sm:$0xff]  }
  0x45   :  { %2067 = vmatprep.subr.bf16.mxu1 %v4437_v8  ;;  %2042 = vmatprep.mubr.bf16.mxu0 %v4655_v1  ;;  %v4525_v8 = vld [vmem:[%s6101_s0 + $0x468] ss:$432 sps:$4 sm:$0xff]  }
  0x46   :  { %2085 = vmatprep.mubr.bf16.mxu1 %v4655_v1 }
  0x47   :  { %2025 = vmatpush1.bf16.msra.mxu0 %v4432_v10  ;;  %v4530_v10 = vld [vmem:[%s6101_s0 + $0x104] ss:$432 sps:$4 sm:$0xff]  }
  0x48   :  { %2068 = vmatpush1.bf16.msra.mxu1 %v4435_v11  ;;  %2108 = vmatprep.subr.bf16.mxu0 %v4440_v12  ;;  %v4533_v11 = vld [vmem:[%s6101_s0 + $0x10c] ss:$432 sps:$4 sm:$0xff]   ;;  %v4528_v12 = vld [vmem:[%s6101_s0 + $0x100] ss:$432 sps:$4 sm:$0xff]  }
  0x49   :  { %2151 = vmatprep.subr.bf16.mxu1 %v4443_v13  ;;  %v4531_v13 = vld [vmem:[%s6101_s0 + $0x108] ss:$432 sps:$4 sm:$0xff]  }
  0x4a   :  { %4265 = vmatmul.mubr.msk.bf16.vlgmr.msra.gmra.mxu0 %vm1318_vm0, %v4706_v9 }
  0x4b   :  { %4266 = vmatmul.mubr.msk.bf16.vlgmr.msra.gmra.mxu1 %vm1318_vm0, %v4706_v9  ;;  %2109 = vmatpush1.bf16.msra.mxu0 %v4438_v14  ;;  %v4536_v14 = vld [vmem:[%s6101_s0 + $0x474] ss:$432 sps:$4 sm:$0xff]  }
  0x4c   :  { %2152 = vmatpush1.bf16.msra.mxu1 %v4441_v15  ;;  %2110 = vmatprep.subr.bf16.mxu0 %v4446_v16  ;;  %v4534_v15 = vld [vmem:[%s6101_s0 + $0x470] ss:$432 sps:$4 sm:$0xff]   ;;  %v4537_v16 = vld [vmem:[%s6101_s0 + $0x478] ss:$432 sps:$4 sm:$0xff]  }
  0x4d   :  { %2153 = vmatprep.subr.bf16.mxu1 %v4449_v17  ;;  %2128 = vmatprep.mubr.bf16.mxu0 %v4655_v1  ;;  %v4542_v17 = vld [vmem:[%s6101_s0 + $0x114] ss:$432 sps:$4 sm:$0xff]  }
  0x4e   :  { %2171 = vmatprep.mubr.bf16.mxu1 %v4655_v1 }
  0x4f   :  { %2111 = vmatpush1.bf16.msra.mxu0 %v4444_v18  ;;  %v4545_v18 = vld [vmem:[%s6101_s0 + $0x11c] ss:$432 sps:$4 sm:$0xff]  }
  0x50   :  { %2154 = vmatpush1.bf16.msra.mxu1 %v4447_v19  ;;  %2194 = vmatprep.subr.bf16.mxu0 %v4452_v20  ;;  %v5209_v19 = vld [vmem:[%s6102_s1] sm:$0xff]  }
  0x51   :  { %2237 = vmatprep.subr.bf16.mxu1 %v4455_v21  ;;  %v4540_v20 = vld [vmem:[%s6101_s0 + $0x110] ss:$432 sps:$4 sm:$0xff]   ;;  %v4543_v21 = vld [vmem:[%s6101_s0 + $0x118] ss:$432 sps:$4 sm:$0xff]  }
  0x52   :  { %4267 = vmatmul.mubr.msk.bf16.vlgmr.msra.gmra.mxu0 %vm1318_vm0, %v4706_v9 }
  0x53   :  { %4268 = vmatmul.mubr.msk.bf16.vlgmr.msra.gmra.mxu1 %vm1318_vm0, %v4706_v9  ;;  %2195 = vmatpush1.bf16.msra.mxu0 %v4450_v22  ;;  %v4548_v22 = vld [vmem:[%s6101_s0 + $0x484] ss:$432 sps:$4 sm:$0xff]  }
  0x54   :  { %2238 = vmatpush1.bf16.msra.mxu1 %v4453_v23  ;;  %2196 = vmatprep.subr.bf16.mxu0 %v4458_v24  ;;  %v4551_v23 = vld [vmem:[%s6101_s0 + $0x48c] ss:$432 sps:$4 sm:$0xff]   ;;  %v4546_v24 = vld [vmem:[%s6101_s0 + $0x480] ss:$432 sps:$4 sm:$0xff]  }
  0x55   :  { %2239 = vmatprep.subr.bf16.mxu1 %v4461_v25  ;;  %2214 = vmatprep.mubr.bf16.mxu0 %v4655_v1  ;;  %v4549_v25 = vld [vmem:[%s6101_s0 + $0x488] ss:$432 sps:$4 sm:$0xff]  }
  0x56   :  { %2257 = vmatprep.mubr.bf16.mxu1 %v4655_v1 }
  0x57   :  { %2197 = vmatpush1.bf16.msra.mxu0 %v4456_v26  ;;  %v4554_v26 = vld [vmem:[%s6101_s0 + $0x124] ss:$432 sps:$4 sm:$0xff]  }
  0x58   :  { %2240 = vmatpush1.bf16.msra.mxu1 %v4459_v27  ;;  %2280 = vmatprep.subr.bf16.mxu0 %v4464_v28  ;;  %v4557_v27 = vld [vmem:[%s6101_s0 + $0x12c] ss:$432 sps:$4 sm:$0xff]   ;;  %v3836_v28 = vld [vmem:[%s6103_s2] sm:$0xff] }
  0x59   :  { %2323 = vmatprep.subr.bf16.mxu1 %v4467_v29  ;;  %3840 = vperm.xlu0 %4328, %v3836_v28   ;;  %v4552_v29 = vld [vmem:[%s6101_s0 + $0x120] ss:$432 sps:$4 sm:$0xff]  }
  0x5a   :  { %4269 = vmatmul.mubr.msk.bf16.vlgmr.msra.gmra.mxu0 %vm1318_vm0, %v4706_v9 }
  0x5b   :  { %4270 = vmatmul.mubr.msk.bf16.vlgmr.msra.gmra.mxu1 %vm1318_vm0, %v4706_v9  ;;  %2281 = vmatpush1.bf16.msra.mxu0 %v4462_v30  ;;  %v4555_v30 = vld [vmem:[%s6101_s0 + $0x128] ss:$432 sps:$4 sm:$0xff]  }
  0x5c   :  { %2324 = vmatpush1.bf16.msra.mxu1 %v4465_v31  ;;  %2282 = vmatprep.subr.bf16.mxu0 %v4470_v32  ;;  %v4560_v31 = vld [vmem:[%s6101_s0 + $0x494] ss:$432 sps:$4 sm:$0xff]   ;;  %v4563_v32 = vld [vmem:[%s6101_s0 + $0x49c] ss:$432 sps:$4 sm:$0xff]  }
  0x5d   :  { %2325 = vmatprep.subr.bf16.mxu1 %v4473_v33  ;;  %2300 = vmatprep.mubr.bf16.mxu0 %v4655_v1  ;;  %v3837_v33 = vld [vmem:[%s6103_s2 + $0x8] sm:$0xff] }
  0x5e   :  { %2343 = vmatprep.mubr.bf16.mxu1 %v4655_v1  ;;  %3845 = vperm.xlu0 %4328, %v3837_v33  }
  0x5f   :  { %2283 = vmatpush1.bf16.msra.mxu0 %v4468_v34  ;;  %v4558_v34 = vld [vmem:[%s6101_s0 + $0x490] ss:$432 sps:$4 sm:$0xff]  }
  0x60   :  { %2326 = vmatpush1.bf16.msra.mxu1 %v4471_v35  ;;  %2366 = vmatprep.subr.bf16.mxu0 %v4476_v36  ;;  %v4561_v35 = vld [vmem:[%s6101_s0 + $0x498] ss:$432 sps:$4 sm:$0xff]   ;;  %v4566_v36 = vld [vmem:[%s6101_s0 + $0x134] ss:$432 sps:$4 sm:$0xff]  }
  0x61   :  { %2409 = vmatprep.subr.bf16.mxu1 %v4479_v37  ;;  %v4569_v37 = vld [vmem:[%s6101_s0 + $0x13c] ss:$432 sps:$4 sm:$0xff]  }
  0x62   :  { %4271 = vmatmul.mubr.msk.bf16.vlgmr.msra.gmra.mxu0 %vm1318_vm0, %v4706_v9 }
  0x63   :  { %4272 = vmatmul.mubr.msk.bf16.vlgmr.msra.gmra.mxu1 %vm1318_vm0, %v4706_v9  ;;  %2367 = vmatpush1.bf16.msra.mxu0 %v4474_v38  ;;  %v4564_v38 = vld [vmem:[%s6101_s0 + $0x130] ss:$432 sps:$4 sm:$0xff]  }
  0x64   :  { %2410 = vmatpush1.bf16.msra.mxu1 %v4477_v39  ;;  %2368 = vmatprep.subr.bf16.mxu0 %v4482_v40  ;;  %v4567_v39 = vld [vmem:[%s6101_s0 + $0x138] ss:$432 sps:$4 sm:$0xff]   ;;  %v4572_v40 = vld [vmem:[%s6101_s0 + $0x4a4] ss:$432 sps:$4 sm:$0xff]  }
  0x65   :  { %2411 = vmatprep.subr.bf16.mxu1 %v4485_v41  ;;  %2386 = vmatprep.mubr.bf16.mxu0 %v4655_v1  ;;  %v4575_v41 = vld [vmem:[%s6101_s0 + $0x4ac] ss:$432 sps:$4 sm:$0xff]  }
  0x66   :  { %2429 = vmatprep.mubr.bf16.mxu1 %v4655_v1 }
  0x67   :  { %2369 = vmatpush1.bf16.msra.mxu0 %v4480_v42  ;;  %v4570_v42 = vld [vmem:[%s6101_s0 + $0x4a0] ss:$432 sps:$4 sm:$0xff]  }
  0x68   :  { %2412 = vmatpush1.bf16.msra.mxu1 %v4483_v43  ;;  %2452 = vmatprep.subr.bf16.mxu0 %v4488_v44  ;;  %v4573_v43 = vld [vmem:[%s6101_s0 + $0x4a8] ss:$432 sps:$4 sm:$0xff]   ;;  %v4578_v44 = vld [vmem:[%s6101_s0 + $0x144] ss:$432 sps:$4 sm:$0xff]  }
  0x69   :  { %2495 = vmatprep.subr.bf16.mxu1 %v4491_v45  ;;  %v4581_v45 = vld [vmem:[%s6101_s0 + $0x14c] ss:$432 sps:$4 sm:$0xff]  }
  0x6a   :  { %4273 = vmatmul.mubr.msk.bf16.vlgmr.msra.gmra.mxu0 %vm1318_vm0, %v4706_v9 }
  0x6b   :  { %4274 = vmatmul.mubr.msk.bf16.vlgmr.msra.gmra.mxu1 %vm1318_vm0, %v4706_v9  ;;  %2453 = vmatpush1.bf16.msra.mxu0 %v4486_v46  ;;  %v4576_v46 = vld [vmem:[%s6101_s0 + $0x140] ss:$432 sps:$4 sm:$0xff]  }
  0x6c   :  { %2496 = vmatpush1.bf16.msra.mxu1 %v4489_v47  ;;  %2454 = vmatprep.subr.bf16.mxu0 %v4494_v48  ;;  %v4579_v47 = vld [vmem:[%s6101_s0 + $0x148] ss:$432 sps:$4 sm:$0xff]   ;;  %v4584_v48 = vld [vmem:[%s6101_s0 + $0x4b4] ss:$432 sps:$4 sm:$0xff]  }
  0x6d   :  { %2497 = vmatprep.subr.bf16.mxu1 %v4497_v49  ;;  %2472 = vmatprep.mubr.bf16.mxu0 %v4655_v1  ;;  %v4587_v49 = vld [vmem:[%s6101_s0 + $0x4bc] ss:$432 sps:$4 sm:$0xff]  }
  0x6e   :  { %2515 = vmatprep.mubr.bf16.mxu1 %v4655_v1 }
  0x6f   :  { %2455 = vmatpush1.bf16.msra.mxu0 %v4492_v50  ;;  %v4582_v50 = vld [vmem:[%s6101_s0 + $0x4b0] ss:$432 sps:$4 sm:$0xff]  }
  0x70   :  { %2498 = vmatpush1.bf16.msra.mxu1 %v4495_v51  ;;  %2538 = vmatprep.subr.bf16.mxu0 %v4500_v52  ;;  %v4585_v51 = vld [vmem:[%s6101_s0 + $0x4b8] ss:$432 sps:$4 sm:$0xff]   ;;  %v4590_v52 = vld [vmem:[%s6101_s0 + $0x154] ss:$432 sps:$4 sm:$0xff]  }
  0x71   :  { %2581 = vmatprep.subr.bf16.mxu1 %v4503_v53  ;;  %v4593_v53 = vld [vmem:[%s6101_s0 + $0x15c] ss:$432 sps:$4 sm:$0xff]  }
  0x72   :  { %4275 = vmatmul.mubr.msk.bf16.vlgmr.msra.gmra.mxu0 %vm1318_vm0, %v4706_v9 }
  0x73   :  { %4276 = vmatmul.mubr.msk.bf16.vlgmr.msra.gmra.mxu1 %vm1318_vm0, %v4706_v9  ;;  %2539 = vmatpush1.bf16.msra.mxu0 %v4498_v54  ;;  %v4588_v54 = vld [vmem:[%s6101_s0 + $0x150] ss:$432 sps:$4 sm:$0xff]  }
  0x74   :  { %2582 = vmatpush1.bf16.msra.mxu1 %v4501_v55  ;;  %2540 = vmatprep.subr.bf16.mxu0 %v4506_v56  ;;  %v4591_v55 = vld [vmem:[%s6101_s0 + $0x158] ss:$432 sps:$4 sm:$0xff]   ;;  %v4596_v56 = vld [vmem:[%s6101_s0 + $0x4c4] ss:$432 sps:$4 sm:$0xff]  }
  0x75   :  { %2583 = vmatprep.subr.bf16.mxu1 %v4509_v57  ;;  %2558 = vmatprep.mubr.bf16.mxu0 %v4655_v1  ;;  %v4599_v57 = vld [vmem:[%s6101_s0 + $0x4cc] ss:$432 sps:$4 sm:$0xff]  }
  0x76   :  { %2601 = vmatprep.mubr.bf16.mxu1 %v4655_v1 }
  0x77   :  { %2541 = vmatpush1.bf16.msra.mxu0 %v4504_v58  ;;  %v4594_v58 = vld [vmem:[%s6101_s0 + $0x4c0] ss:$432 sps:$4 sm:$0xff]  }
  0x78   :  { %2584 = vmatpush1.bf16.msra.mxu1 %v4507_v59  ;;  %2624 = vmatprep.subr.bf16.mxu0 %v4512_v60  ;;  %v4597_v59 = vld [vmem:[%s6101_s0 + $0x4c8] ss:$432 sps:$4 sm:$0xff]   ;;  %v4602_v60 = vld [vmem:[%s6101_s0 + $0x164] ss:$432 sps:$4 sm:$0xff]  }
  0x79   :  { %2667 = vmatprep.subr.bf16.mxu1 %v4515_v61  ;;  %v4605_v61 = vld [vmem:[%s6101_s0 + $0x16c] ss:$432 sps:$4 sm:$0xff]  }
  0x7a   :  { %4277 = vmatmul.mubr.msk.bf16.vlgmr.msra.gmra.mxu0 %vm1318_vm0, %v4706_v9 }
  0x7b   :  { %4278 = vmatmul.mubr.msk.bf16.vlgmr.msra.gmra.mxu1 %vm1318_vm0, %v4706_v9  ;;  %2625 = vmatpush1.bf16.msra.mxu0 %v4510_v62  ;;  %v4600_v62 = vld [vmem:[%s6101_s0 + $0x160] ss:$432 sps:$4 sm:$0xff]  }
  0x7c   :  { %2668 = vmatpush1.bf16.msra.mxu1 %v4513_v63  ;;  %2626 = vmatprep.subr.bf16.mxu0 %v4518_v0  ;;  %v4603_v63 = vld [vmem:[%s6101_s0 + $0x168] ss:$432 sps:$4 sm:$0xff]   ;;  %v4608_v0 = vld [vmem:[%s6101_s0 + $0x4d4] ss:$432 sps:$4 sm:$0xff]  }
  0x7d   :  { %2669 = vmatprep.subr.bf16.mxu1 %v4521_v2  ;;  %2644 = vmatprep.mubr.bf16.mxu0 %v4655_v1  ;;  %v4611_v2 = vld [vmem:[%s6101_s0 + $0x4dc] ss:$432 sps:$4 sm:$0xff]  }
  0x7e   :  { %2687 = vmatprep.mubr.bf16.mxu1 %v4655_v1 }
  0x7f   :  { %2627 = vmatpush1.bf16.msra.mxu0 %v4516_v3  ;;  %v4606_v3 = vld [vmem:[%s6101_s0 + $0x4d0] ss:$432 sps:$4 sm:$0xff]  }
  0x80   :  { %2670 = vmatpush1.bf16.msra.mxu1 %v4519_v4  ;;  %2710 = vmatprep.subr.bf16.mxu0 %v4524_v5  ;;  %v4609_v4 = vld [vmem:[%s6101_s0 + $0x4d8] ss:$432 sps:$4 sm:$0xff]   ;;  %v4614_v5 = vld [vmem:[%s6101_s0 + $0x174] ss:$432 sps:$4 sm:$0xff]  }
  0x81   :  { %2753 = vmatprep.subr.bf16.mxu1 %v4527_v6  ;;  %v4617_v6 = vld [vmem:[%s6101_s0 + $0x17c] ss:$432 sps:$4 sm:$0xff]  }
  0x82   :  { %4279 = vmatmul.mubr.msk.bf16.vlgmr.msra.gmra.mxu0 %vm1318_vm0, %v4706_v9 }
  0x83   :  { %4280 = vmatmul.mubr.msk.bf16.vlgmr.msra.gmra.mxu1 %vm1318_vm0, %v4706_v9  ;;  %2711 = vmatpush1.bf16.msra.mxu0 %v4522_v7  ;;  %v4539_v9 = vld [vmem:[%s6101_s0 + $0x47c] ss:$432 sps:$4 sm:$0xff]   ;;  %v4612_v7 = vld [vmem:[%s6101_s0 + $0x170] ss:$432 sps:$4 sm:$0xff]  }
  0x84   :  { %2754 = vmatpush1.bf16.msra.mxu1 %v4525_v8  ;;  %2712 = vmatprep.subr.bf16.mxu0 %v4530_v10  ;;  %v4615_v8 = vld [vmem:[%s6101_s0 + $0x178] ss:$432 sps:$4 sm:$0xff]   ;;  %v4620_v10 = vld [vmem:[%s6101_s0 + $0x4e4] ss:$432 sps:$4 sm:$0xff]  }
  0x85   :  { %2755 = vmatprep.subr.bf16.mxu1 %v4533_v11  ;;  %2730 = vmatprep.mubr.bf16.mxu0 %v4655_v1  ;;  %v4623_v11 = vld [vmem:[%s6101_s0 + $0x4ec] ss:$432 sps:$4 sm:$0xff]  }
  0x86   :  { %2773 = vmatprep.mubr.bf16.mxu1 %v4655_v1 }
  0x87   :  { %2713 = vmatpush1.bf16.msra.mxu0 %v4528_v12  ;;  %v4618_v12 = vld [vmem:[%s6101_s0 + $0x4e0] ss:$432 sps:$4 sm:$0xff]  }
  0x88   :  { %2756 = vmatpush1.bf16.msra.mxu1 %v4531_v13  ;;  %2796 = vmatprep.subr.bf16.mxu0 %v4536_v14  ;;  %v4621_v13 = vld [vmem:[%s6101_s0 + $0x4e8] ss:$432 sps:$4 sm:$0xff]   ;;  %v4626_v14 = vld [vmem:[%s6101_s0 + $0x184] ss:$432 sps:$4 sm:$0xff]  }
  0x89   :  { %2839 = vmatprep.subr.bf16.mxu1 %v4539_v9  ;;  %v4629_v9 = vld [vmem:[%s6101_s0 + $0x18c] ss:$432 sps:$4 sm:$0xff]  }
  0x8a   :  { %4281 = vmatmul.mubr.msk.bf16.vlgmr.msra.gmra.mxu0 %vm1318_vm0, %v5209_v19 }
  0x8b   :  { %4282 = vmatmul.mubr.msk.bf16.vlgmr.msra.gmra.mxu1 %vm1318_vm0, %v5209_v19  ;;  %2797 = vmatpush1.bf16.msra.mxu0 %v4534_v15  ;;  %v4624_v15 = vld [vmem:[%s6101_s0 + $0x180] ss:$432 sps:$4 sm:$0xff]  }
  0x8c   :  { %2840 = vmatpush1.bf16.msra.mxu1 %v4537_v16  ;;  %2798 = vmatprep.subr.bf16.mxu0 %v4542_v17  ;;  %v4627_v16 = vld [vmem:[%s6101_s0 + $0x188] ss:$432 sps:$4 sm:$0xff]   ;;  %v4632_v17 = vld [vmem:[%s6101_s0 + $0x4f4] ss:$432 sps:$4 sm:$0xff]  }
  0x8d   :  { %2841 = vmatprep.subr.bf16.mxu1 %v4545_v18  ;;  %2816 = vmatprep.mubr.bf16.mxu0 %v4655_v1  ;;  %v4635_v18 = vld [vmem:[%s6101_s0 + $0x4fc] ss:$432 sps:$4 sm:$0xff]  }
  0x8e   :  { %2859 = vmatprep.mubr.bf16.mxu1 %v4655_v1 }
  0x8f   :  { %2799 = vmatpush1.bf16.msra.mxu0 %v4540_v20  ;;  %v4630_v20 = vld [vmem:[%s6101_s0 + $0x4f0] ss:$432 sps:$4 sm:$0xff]  }
  0x90   :  { %2842 = vmatpush1.bf16.msra.mxu1 %v4543_v21  ;;  %2882 = vmatprep.subr.bf16.mxu0 %v4548_v22  ;;  %v4633_v21 = vld [vmem:[%s6101_s0 + $0x4f8] ss:$432 sps:$4 sm:$0xff]   ;;  %v4638_v22 = vld [vmem:[%s6101_s0 + $0x194] ss:$432 sps:$4 sm:$0xff]  }
  0x91   :  { %2925 = vmatprep.subr.bf16.mxu1 %v4551_v23  ;;  %v4641_v23 = vld [vmem:[%s6101_s0 + $0x19c] ss:$432 sps:$4 sm:$0xff]  }
  0x92   :  { %4283 = vmatmul.mubr.msk.bf16.vlgmr.msra.gmra.mxu0 %vm1318_vm0, %v5209_v19 }
  0x93   :  { %4284 = vmatmul.mubr.msk.bf16.vlgmr.msra.gmra.mxu1 %vm1318_vm0, %v5209_v19  ;;  %2883 = vmatpush1.bf16.msra.mxu0 %v4546_v24 }
  0x94   :  { %2926 = vmatpush1.bf16.msra.mxu1 %v4549_v25  ;;  %2884 = vmatprep.subr.bf16.mxu0 %v4554_v26  ;;  %v4636_v26 = vld [vmem:[%s6101_s0 + $0x190] ss:$432 sps:$4 sm:$0xff]  }
  0x95   :  { %2927 = vmatprep.subr.bf16.mxu1 %v4557_v27  ;;  %2902 = vmatprep.mubr.bf16.mxu0 %v4655_v1  ;;  %v4639_v27 = vld [vmem:[%s6101_s0 + $0x198] ss:$432 sps:$4 sm:$0xff]  }
  0x96   :  { %2945 = vmatprep.mubr.bf16.mxu1 %v4655_v1 }
  0x97   :  { %2885 = vmatpush1.bf16.msra.mxu0 %v4552_v29 }
  0x98   :  { %2928 = vmatpush1.bf16.msra.mxu1 %v4555_v30  ;;  %2968 = vmatprep.subr.bf16.mxu0 %v4560_v31  ;;  %v4644_v30 = vld [vmem:[%s6101_s0 + $0x504] ss:$432 sps:$4 sm:$0xff]   ;;  %v4647_v31 = vld [vmem:[%s6101_s0 + $0x50c] ss:$432 sps:$4 sm:$0xff]  }
  0x99   :  { %3011 = vmatprep.subr.bf16.mxu1 %v4563_v32 }
  0x9a   :  { %4285 = vmatmul.mubr.msk.bf16.vlgmr.msra.gmra.mxu0 %vm1318_vm0, %v5209_v19 }
  0x9b   :  { %4286 = vmatmul.mubr.msk.bf16.vlgmr.msra.gmra.mxu1 %vm1318_vm0, %v5209_v19  ;;  %2969 = vmatpush1.bf16.msra.mxu0 %v4558_v34  ;;  %v4642_v34 = vld [vmem:[%s6101_s0 + $0x500] ss:$432 sps:$4 sm:$0xff]  }
  0x9c   :  { %3012 = vmatpush1.bf16.msra.mxu1 %v4561_v35  ;;  %2970 = vmatprep.subr.bf16.mxu0 %v4566_v36  ;;  %v4645_v35 = vld [vmem:[%s6101_s0 + $0x508] ss:$432 sps:$4 sm:$0xff]  }
  0x9d   :  { %3013 = vmatprep.subr.bf16.mxu1 %v4569_v37  ;;  %2988 = vmatprep.mubr.bf16.mxu0 %v4655_v1 }
  0x9e   :  { %3031 = vmatprep.mubr.bf16.mxu1 %v4655_v1 }
  0x9f   :  { %2971 = vmatpush1.bf16.msra.mxu0 %v4564_v38  ;;  %v4650_v38 = vld [vmem:[%s6101_s0 + $0x1a4] ss:$432 sps:$4 sm:$0xff]  }
  0xa0   :  { %3014 = vmatpush1.bf16.msra.mxu1 %v4567_v39  ;;  %3054 = vmatprep.subr.bf16.mxu0 %v4572_v40  ;;  %v4653_v39 = vld [vmem:[%s6101_s0 + $0x1ac] ss:$432 sps:$4 sm:$0xff]  }
  0xa1   :  { %3097 = vmatprep.subr.bf16.mxu1 %v4575_v41 }
  0xa2   :  { %4287 = vmatmul.mubr.msk.bf16.vlgmr.msra.gmra.mxu0 %vm1318_vm0, %v5209_v19 }
  0xa3   :  { %4288 = vmatmul.mubr.msk.bf16.vlgmr.msra.gmra.mxu1 %vm1318_vm0, %v5209_v19  ;;  %3055 = vmatpush1.bf16.msra.mxu0 %v4570_v42  ;;  %v4648_v42 = vld [vmem:[%s6101_s0 + $0x1a0] ss:$432 sps:$4 sm:$0xff]  }
  0xa4   :  { %3098 = vmatpush1.bf16.msra.mxu1 %v4573_v43  ;;  %3056 = vmatprep.subr.bf16.mxu0 %v4578_v44  ;;  %v4651_v43 = vld [vmem:[%s6101_s0 + $0x1a8] ss:$432 sps:$4 sm:$0xff]  }
  0xa5   :  { %3099 = vmatprep.subr.bf16.mxu1 %v4581_v45  ;;  %3074 = vmatprep.mubr.bf16.mxu0 %v4655_v1 }
  0xa6   :  { %3117 = vmatprep.mubr.bf16.mxu1 %v4655_v1 }
  0xa7   :  { %3057 = vmatpush1.bf16.msra.mxu0 %v4576_v46 }
  0xa8   :  { %3100 = vmatpush1.bf16.msra.mxu1 %v4579_v47  ;;  %3140 = vmatprep.subr.bf16.mxu0 %v4584_v48 }
  0xa9   :  { %3183 = vmatprep.subr.bf16.mxu1 %v4587_v49 }
  0xaa   :  { %4289 = vmatmul.mubr.msk.bf16.vlgmr.msra.gmra.mxu0 %vm1318_vm0, %v5209_v19 }
  0xab   :  { %4290 = vmatmul.mubr.msk.bf16.vlgmr.msra.gmra.mxu1 %vm1318_vm0, %v5209_v19  ;;  %3141 = vmatpush1.bf16.msra.mxu0 %v4582_v50 }
  0xac   :  { %3184 = vmatpush1.bf16.msra.mxu1 %v4585_v51  ;;  %3142 = vmatprep.subr.bf16.mxu0 %v4590_v52 }
  0xad   :  { %3185 = vmatprep.subr.bf16.mxu1 %v4593_v53  ;;  %3160 = vmatprep.mubr.bf16.mxu0 %v4655_v1 }
  0xae   :  { %3203 = vmatprep.mubr.bf16.mxu1 %v4655_v1 }
  0xaf   :  { %3143 = vmatpush1.bf16.msra.mxu0 %v4588_v54 }
  0xb0   :  { %3186 = vmatpush1.bf16.msra.mxu1 %v4591_v55  ;;  %3226 = vmatprep.subr.bf16.mxu0 %v4596_v56 }
  0xb1   :  { %3269 = vmatprep.subr.bf16.mxu1 %v4599_v57 }
  0xb2   :  { %4291 = vmatmul.mubr.msk.bf16.vlgmr.msra.gmra.mxu0 %vm1318_vm0, %v5209_v19 }
  0xb3   :  { %4292 = vmatmul.mubr.msk.bf16.vlgmr.msra.gmra.mxu1 %vm1318_vm0, %v5209_v19  ;;  %3227 = vmatpush1.bf16.msra.mxu0 %v4594_v58 }
  0xb4   :  { %3270 = vmatpush1.bf16.msra.mxu1 %v4597_v59  ;;  %3228 = vmatprep.subr.bf16.mxu0 %v4602_v60 }
  0xb5   :  { %3271 = vmatprep.subr.bf16.mxu1 %v4605_v61  ;;  %3246 = vmatprep.mubr.bf16.mxu0 %v4655_v1 }
  0xb6   :  { %3289 = vmatprep.mubr.bf16.mxu1 %v4655_v1 }
  0xb7   :  { %3229 = vmatpush1.bf16.msra.mxu0 %v4600_v62 }
  0xb8   :  { %3272 = vmatpush1.bf16.msra.mxu1 %v4603_v63  ;;  %3312 = vmatprep.subr.bf16.mxu0 %v4608_v0 }
  0xb9   :  { %3355 = vmatprep.subr.bf16.mxu1 %v4611_v2 }
  0xba   :  { %4293 = vmatmul.mubr.msk.bf16.vlgmr.msra.gmra.mxu0 %vm1318_vm0, %v5209_v19 }
  0xbb   :  { %4294 = vmatmul.mubr.msk.bf16.vlgmr.msra.gmra.mxu1 %vm1318_vm0, %v5209_v19  ;;  %3313 = vmatpush1.bf16.msra.mxu0 %v4606_v3 }
  0xbc   :  { %3356 = vmatpush1.bf16.msra.mxu1 %v4609_v4  ;;  %3314 = vmatprep.subr.bf16.mxu0 %v4614_v5 }
  0xbd   :  { %3357 = vmatprep.subr.bf16.mxu1 %v4617_v6  ;;  %3332 = vmatprep.mubr.bf16.mxu0 %v4655_v1 }
  0xbe   :  { %3375 = vmatprep.mubr.bf16.mxu1 %v4655_v1 }
  0xbf   :  { %3315 = vmatpush1.bf16.msra.mxu0 %v4612_v7 }
  0xc0   :  { %3358 = vmatpush1.bf16.msra.mxu1 %v4615_v8  ;;  %3398 = vmatprep.subr.bf16.mxu0 %v4620_v10 }
  0xc1   :  { %3441 = vmatprep.subr.bf16.mxu1 %v4623_v11 }
  0xc2   :  { %4295 = vmatmul.mubr.msk.bf16.vlgmr.msra.gmra.mxu0 %vm1318_vm0, %v5209_v19 }
  0xc3   :  { %4296 = vmatmul.mubr.msk.bf16.vlgmr.msra.gmra.mxu1 %vm1318_vm0, %v5209_v19  ;;  %3399 = vmatpush1.bf16.msra.mxu0 %v4618_v12 }
  0xc4   :  { %3442 = vmatpush1.bf16.msra.mxu1 %v4621_v13  ;;  %3400 = vmatprep.subr.bf16.mxu0 %v4626_v14 }
  0xc5   :  { %3443 = vmatprep.subr.bf16.mxu1 %v4629_v9  ;;  %3418 = vmatprep.mubr.bf16.mxu0 %v4655_v1 }
  0xc6   :  { %3461 = vmatprep.mubr.bf16.mxu1 %v4655_v1 }
  0xc7   :  { %3401 = vmatpush1.bf16.msra.mxu0 %v4624_v15 }
  0xc8   :  { %3444 = vmatpush1.bf16.msra.mxu1 %v4627_v16  ;;  %3484 = vmatprep.subr.bf16.mxu0 %v4632_v17 }
  0xc9   :  { %3527 = vmatprep.subr.bf16.mxu1 %v4635_v18 }
  0xca   :  { %v5457_v24 = vpop.f32.mrf.mxu0  ;;  %4297 = vmatmul.mubr.msk.bf16.vlgmr.msra.gmra.mxu0 %vm1318_vm0, %v5209_v19 }
  0xcb   :  { %v5459_v25 = vpop.f32.mrf.mxu1  ;;  %4298 = vmatmul.mubr.msk.bf16.vlgmr.msra.gmra.mxu1 %vm1318_vm0, %v5209_v19  ;;  %3485 = vmatpush1.bf16.msra.mxu0 %v4630_v20 }
  0xcc   :  { %3528 = vmatpush1.bf16.msra.mxu1 %v4633_v21  ;;  %v5471_v28 = vpop.f32.mrf.mxu0  ;;  %3486 = vmatprep.subr.bf16.mxu0 %v4638_v22 }
  0xcd   :  { %v5473_v29 = vpop.f32.mrf.mxu1  ;;  %3529 = vmatprep.subr.bf16.mxu1 %v4641_v23  ;;  %3504 = vmatprep.mubr.bf16.mxu0 %v4655_v1 }
  0xce   :  { %3547 = vmatprep.mubr.bf16.mxu1 %v4655_v1  ;;  %v5483_v32 = vpop.f32.mrf.mxu0 }
  0xcf   :  { %v5485_v33 = vpop.f32.mrf.mxu1  ;;  %3487 = vmatpush1.bf16.msra.mxu0 %v4636_v26 }
  0xd0   :  { %3530 = vmatpush1.bf16.msra.mxu1 %v4639_v27  ;;  %v5493_v36 = vpop.f32.mrf.mxu0  ;;  %3570 = vmatprep.subr.bf16.mxu0 %v4644_v30 }
  0xd1   :  { %v5495_v37 = vpop.f32.mrf.mxu1  ;;  %3613 = vmatprep.subr.bf16.mxu1 %v4647_v31 }
  0xd2   :  { %v5503_v40 = vpop.f32.mrf.mxu0  ;;  %4299 = vmatmul.mubr.msk.bf16.vlgmr.msra.gmra.mxu0 %vm1318_vm0, %v5209_v19 }
  0xd3   :  { %v5505_v41 = vpop.f32.mrf.mxu1  ;;  %4300 = vmatmul.mubr.msk.bf16.vlgmr.msra.gmra.mxu1 %vm1318_vm0, %v5209_v19  ;;  %3571 = vmatpush1.bf16.msra.mxu0 %v4642_v34 }
  0xd4   :  { %3614 = vmatpush1.bf16.msra.mxu1 %v4645_v35  ;;  %v5517_v44 = vpop.f32.mrf.mxu0  ;;  %3572 = vmatprep.subr.bf16.mxu0 %v4650_v38 }
  0xd5   :  { %v5519_v45 = vpop.f32.mrf.mxu1  ;;  %3615 = vmatprep.subr.bf16.mxu1 %v4653_v39  ;;  %3590 = vmatprep.mubr.bf16.mxu0 %v4655_v1 }
  0xd6   :  { %3633 = vmatprep.mubr.bf16.mxu1 %v4655_v1  ;;  %v5523_v46 = vpop.f32.mrf.mxu0 }
  0xd7   :  { %v5525_v47 = vpop.f32.mrf.mxu1  ;;  %3573 = vmatpush1.bf16.msra.mxu0 %v4648_v42 }
  0xd8   :  { %3616 = vmatpush1.bf16.msra.mxu1 %v4651_v43  ;;  %v5527_v48 = vpop.f32.mrf.mxu0 }
  0xd9   :  { %v5529_v49 = vpop.f32.mrf.mxu1 }
  0xda   :  { %v5531_v50 = vpop.f32.mrf.mxu0  ;;  %4301 = vmatmul.mubr.msk.bf16.vlgmr.msra.gmra.mxu0 %vm1318_vm0, %v5209_v19 }
  0xdb   :  { %v5533_v51 = vpop.f32.mrf.mxu1  ;;  %4302 = vmatmul.mubr.msk.bf16.vlgmr.msra.gmra.mxu1 %vm1318_vm0, %v5209_v19 }
  0xdc   :  { %v5539_v1 = vpop.f32.mrf.mxu0 }
  0xdd   :  { %v5541_v52 = vpop.f32.mrf.mxu1 }
  0xde   :  { %v5543_v53 = vpop.f32.mrf.mxu0 }
  0xdf   :  { %v5545_v54 = vpop.f32.mrf.mxu1 }
  0xe0   :  { %v5547_v55 = vpop.f32.mrf.mxu0 }
  0xe1   :  { %v5549_v56 = vpop.f32.mrf.mxu1 }
  0xe2   :  { %v1614_v57 = vpop.f32.mrf.mxu0 }
  0xe3   :  { %v1657_v58 = vpop.f32.mrf.mxu1  ;;  %v3644_v59 = vmax.f32 %v5457_v24, %v1614_v57 }
  0xe4   :  { %v3646_v60 = vmax.f32 %v5459_v25, %v1657_v58  ;;  %v1616_v61 = vpop.f32.mrf.mxu0 }
  0xe5   :  { %v1659_v19 = vpop.f32.mrf.mxu1  ;;  %v3645_v62 = vmax.f32 %v5471_v28, %v1616_v61 }
  0xe6   :  { %v3647_v63 = vmax.f32 %v5473_v29, %v1659_v19  ;;  %v1618_v0 = vpop.f32.mrf.mxu0 }
  0xe7   :  { %v1661_v2 = vpop.f32.mrf.mxu1  ;;  %v3656_v3 = vmax.f32 %v5483_v32, %v1618_v0 }
  0xe8   :  { %v3658_v4 = vmax.f32 %v5485_v33, %v1661_v2  ;;  %v1620_v5 = vpop.f32.mrf.mxu0 }
  0xe9   :  { %v1663_v6 = vpop.f32.mrf.mxu1  ;;  %v3657_v7 = vmax.f32 %v5493_v36, %v1620_v5 }
  0xea   :  { %v3659_v8 = vmax.f32 %v5495_v37, %v1663_v6  ;;  %v1700_v10 = vpop.f32.mrf.mxu0 }
  0xeb   :  { %v1743_v11 = vpop.f32.mrf.mxu1  ;;  %v3648_v12 = vmax.f32 %v5503_v40, %v1700_v10 }
  0xec   :  { %v3650_v13 = vmax.f32 %v5505_v41, %v1743_v11  ;;  %v1702_v14 = vpop.f32.mrf.mxu0 }
  0xed   :  { %v1745_v9 = vpop.f32.mrf.mxu1  ;;  %v3649_v15 = vmax.f32 %v5517_v44, %v1702_v14 }
  0xee   :  { %v3651_v16 = vmax.f32 %v5519_v45, %v1745_v9  ;;  %v1704_v17 = vpop.f32.mrf.mxu0 }
  0xef   :  { %v1747_v18 = vpop.f32.mrf.mxu1  ;;  %v3660_v20 = vmax.f32 %v5523_v46, %v1704_v17 }
  0xf0   :  { %v3662_v21 = vmax.f32 %v5525_v47, %v1747_v18  ;;  %v1706_v22 = vpop.f32.mrf.mxu0 }
  0xf1   :  { %v1749_v23 = vpop.f32.mrf.mxu1  ;;  %v3661_v24 = vmax.f32 %v5527_v48, %v1706_v22 }
  0xf2   :  { %v3663_v25 = vmax.f32 %v5529_v49, %v1749_v23  ;;  %v1786_v26 = vpop.f32.mrf.mxu0 }
  0xf3   :  { %v1829_v27 = vpop.f32.mrf.mxu1  ;;  %v3652_v28 = vmax.f32 %v5531_v50, %v1786_v26 }
  0xf4   :  { %v3654_v29 = vmax.f32 %v5533_v51, %v1829_v27  ;;  %v1788_v30 = vpop.f32.mrf.mxu0 }
  0xf5   :  { %v1831_v31 = vpop.f32.mrf.mxu1  ;;  %v3653_v32 = vmax.f32 %v5539_v1, %v1788_v30 }
  0xf6   :  { %v3655_v33 = vmax.f32 %v5541_v52, %v1831_v31  ;;  %v1790_v34 = vpop.f32.mrf.mxu0 }
  0xf7   :  { %v1833_v35 = vpop.f32.mrf.mxu1  ;;  %v3664_v36 = vmax.f32 %v5543_v53, %v1790_v34 }
  0xf8   :  { %v3666_v37 = vmax.f32 %v5545_v54, %v1833_v35  ;;  %v1792_v38 = vpop.f32.mrf.mxu0 }
  0xf9   :  { %v1835_v39 = vpop.f32.mrf.mxu1  ;;  %v3665_v40 = vmax.f32 %v5547_v55, %v1792_v38 }
  0xfa   :  { %v3667_v41 = vmax.f32 %v5549_v56, %v1835_v39  ;;  %v1872_v42 = vpop.f32.mrf.mxu0 }
  0xfb   :  { %v1915_v43 = vpop.f32.mrf.mxu1  ;;  %v5575_v44 = vmax.f32 %v3644_v59, %v1872_v42 }
  0xfc   :  { %v5577_v45 = vmax.f32 %v3646_v60, %v1915_v43  ;;  %v1874_v46 = vpop.f32.mrf.mxu0 }
  0xfd   :  { %v1917_v47 = vpop.f32.mrf.mxu1  ;;  %v5579_v48 = vmax.f32 %v3645_v62, %v1874_v46 }
  0xfe   :  { %v5581_v49 = vmax.f32 %v3647_v63, %v1917_v47  ;;  %v1876_v50 = vpop.f32.mrf.mxu0 }
  0xff   :  { %v1919_v51 = vpop.f32.mrf.mxu1  ;;  %v5583_v1 = vmax.f32 %v3656_v3, %v1876_v50 }
 0x100   :  { %v5585_v52 = vmax.f32 %v3658_v4, %v1919_v51  ;;  %v1878_v53 = vpop.f32.mrf.mxu0 }
 0x101   :  { %v1921_v54 = vpop.f32.mrf.mxu1  ;;  %v5587_v55 = vmax.f32 %v3657_v7, %v1878_v53 }
 0x102   :  { %v5589_v56 = vmax.f32 %v3659_v8, %v1921_v54  ;;  %v1958_v57 = vpop.f32.mrf.mxu0 }
 0x103   :  { %v2001_v58 = vpop.f32.mrf.mxu1  ;;  %v5591_v59 = vmax.f32 %v3648_v12, %v1958_v57 }
 0x104   :  { %v5593_v60 = vmax.f32 %v3650_v13, %v2001_v58  ;;  %v1960_v61 = vpop.f32.mrf.mxu0 }
 0x105   :  { %v2003_v19 = vpop.f32.mrf.mxu1  ;;  %v5595_v62 = vmax.f32 %v3649_v15, %v1960_v61 }
 0x106   :  { %v5597_v63 = vmax.f32 %v3651_v16, %v2003_v19  ;;  %v1962_v0 = vpop.f32.mrf.mxu0 }
 0x107   :  { %v2005_v2 = vpop.f32.mrf.mxu1  ;;  %v5599_v3 = vmax.f32 %v3660_v20, %v1962_v0 }
 0x108   :  { %v5601_v4 = vmax.f32 %v3662_v21, %v2005_v2  ;;  %v1964_v5 = vpop.f32.mrf.mxu0 }
 0x109   :  { %v2007_v6 = vpop.f32.mrf.mxu1  ;;  %v5603_v7 = vmax.f32 %v3661_v24, %v1964_v5 }
 0x10a   :  { %v5605_v8 = vmax.f32 %v3663_v25, %v2007_v6  ;;  %v2044_v10 = vpop.f32.mrf.mxu0 }
 0x10b   :  { %v2087_v11 = vpop.f32.mrf.mxu1  ;;  %v5607_v12 = vmax.f32 %v3652_v28, %v2044_v10 }
 0x10c   :  { %v5609_v13 = vmax.f32 %v3654_v29, %v2087_v11  ;;  %v2046_v14 = vpop.f32.mrf.mxu0 }
 0x10d   :  { %v2089_v9 = vpop.f32.mrf.mxu1  ;;  %v5611_v15 = vmax.f32 %v3653_v32, %v2046_v14 }
 0x10e   :  { %v5613_v16 = vmax.f32 %v3655_v33, %v2089_v9  ;;  %v2048_v17 = vpop.f32.mrf.mxu0 }
 0x10f   :  { %v2091_v18 = vpop.f32.mrf.mxu1  ;;  %v5615_v20 = vmax.f32 %v3664_v36, %v2048_v17 }
 0x110   :  { %v5617_v21 = vmax.f32 %v3666_v37, %v2091_v18  ;;  %v2050_v22 = vpop.f32.mrf.mxu0 }
 0x111   :  { %v2093_v23 = vpop.f32.mrf.mxu1  ;;  %v5619_v24 = vmax.f32 %v3665_v40, %v2050_v22 }
 0x112   :  { %v5621_v25 = vmax.f32 %v3667_v41, %v2093_v23  ;;  %v2130_v26 = vpop.f32.mrf.mxu0 }
 0x113   :  { %v2173_v27 = vpop.f32.mrf.mxu1  ;;  %v3692_v28 = vmax.f32 %v5575_v44, %v2130_v26 }
 0x114   :  { %v3694_v29 = vmax.f32 %v5577_v45, %v2173_v27  ;;  %v2132_v30 = vpop.f32.mrf.mxu0 }
 0x115   :  { %v2175_v31 = vpop.f32.mrf.mxu1  ;;  %v3693_v32 = vmax.f32 %v5579_v48, %v2132_v30 }
 0x116   :  { %v3695_v33 = vmax.f32 %v5581_v49, %v2175_v31  ;;  %v2134_v34 = vpop.f32.mrf.mxu0 }
 0x117   :  { %v2177_v35 = vpop.f32.mrf.mxu1  ;;  %v3704_v36 = vmax.f32 %v5583_v1, %v2134_v34 }
 0x118   :  { %v3706_v37 = vmax.f32 %v5585_v52, %v2177_v35  ;;  %v2136_v38 = vpop.f32.mrf.mxu0 }
 0x119   :  { %v2179_v39 = vpop.f32.mrf.mxu1  ;;  %v3705_v40 = vmax.f32 %v5587_v55, %v2136_v38 }
 0x11a   :  { %v3707_v41 = vmax.f32 %v5589_v56, %v2179_v39  ;;  %v2216_v42 = vpop.f32.mrf.mxu0 }
 0x11b   :  { %v2259_v43 = vpop.f32.mrf.mxu1  ;;  %v3696_v44 = vmax.f32 %v5591_v59, %v2216_v42 }
 0x11c   :  { %v3698_v45 = vmax.f32 %v5593_v60, %v2259_v43  ;;  %v2218_v46 = vpop.f32.mrf.mxu0 }
 0x11d   :  { %v2261_v47 = vpop.f32.mrf.mxu1  ;;  %v3697_v48 = vmax.f32 %v5595_v62, %v2218_v46 }
 0x11e   :  { %v3699_v49 = vmax.f32 %v5597_v63, %v2261_v47  ;;  %v2220_v50 = vpop.f32.mrf.mxu0 }
 0x11f   :  { %v2263_v51 = vpop.f32.mrf.mxu1  ;;  %v3708_v1 = vmax.f32 %v5599_v3, %v2220_v50 }
 0x120   :  { %v3710_v52 = vmax.f32 %v5601_v4, %v2263_v51  ;;  %v2222_v53 = vpop.f32.mrf.mxu0 }
 0x121   :  { %v2265_v54 = vpop.f32.mrf.mxu1  ;;  %v3709_v55 = vmax.f32 %v5603_v7, %v2222_v53 }
 0x122   :  { %v3711_v56 = vmax.f32 %v5605_v8, %v2265_v54  ;;  %v2302_v57 = vpop.f32.mrf.mxu0 }
 0x123   :  { %v2345_v58 = vpop.f32.mrf.mxu1  ;;  %v3700_v59 = vmax.f32 %v5607_v12, %v2302_v57 }
 0x124   :  { %v3702_v60 = vmax.f32 %v5609_v13, %v2345_v58  ;;  %v2304_v61 = vpop.f32.mrf.mxu0 }
 0x125   :  { %v2347_v19 = vpop.f32.mrf.mxu1  ;;  %v3701_v62 = vmax.f32 %v5611_v15, %v2304_v61 }
 0x126   :  { %v3703_v63 = vmax.f32 %v5613_v16, %v2347_v19  ;;  %v2306_v0 = vpop.f32.mrf.mxu0 }
 0x127   :  { %v2349_v2 = vpop.f32.mrf.mxu1  ;;  %v3712_v3 = vmax.f32 %v5615_v20, %v2306_v0 }
 0x128   :  { %v3714_v4 = vmax.f32 %v5617_v21, %v2349_v2  ;;  %v2308_v5 = vpop.f32.mrf.mxu0 }
 0x129   :  { %v2351_v6 = vpop.f32.mrf.mxu1  ;;  %v3713_v7 = vmax.f32 %v5619_v24, %v2308_v5 }
 0x12a   :  { %v3715_v8 = vmax.f32 %v5621_v25, %v2351_v6  ;;  %v2388_v10 = vpop.f32.mrf.mxu0 }
 0x12b   :  { %v2431_v11 = vpop.f32.mrf.mxu1  ;;  %v5647_v12 = vmax.f32 %v3692_v28, %v2388_v10 }
 0x12c   :  { %v5649_v13 = vmax.f32 %v3694_v29, %v2431_v11  ;;  %v2390_v14 = vpop.f32.mrf.mxu0 }
 0x12d   :  { %v2433_v9 = vpop.f32.mrf.mxu1  ;;  %v5651_v15 = vmax.f32 %v3693_v32, %v2390_v14 }
 0x12e   :  { %v5653_v16 = vmax.f32 %v3695_v33, %v2433_v9  ;;  %v2392_v17 = vpop.f32.mrf.mxu0 }
 0x12f   :  { %v2435_v18 = vpop.f32.mrf.mxu1  ;;  %v5655_v20 = vmax.f32 %v3704_v36, %v2392_v17 }
 0x130   :  { %v5657_v21 = vmax.f32 %v3706_v37, %v2435_v18  ;;  %v2394_v22 = vpop.f32.mrf.mxu0 }
 0x131   :  { %v2437_v23 = vpop.f32.mrf.mxu1  ;;  %v5659_v24 = vmax.f32 %v3705_v40, %v2394_v22 }
 0x132   :  { %v5661_v25 = vmax.f32 %v3707_v41, %v2437_v23  ;;  %v2474_v26 = vpop.f32.mrf.mxu0 }
 0x133   :  { %v2517_v27 = vpop.f32.mrf.mxu1  ;;  %v5663_v28 = vmax.f32 %v3696_v44, %v2474_v26 }
 0x134   :  { %v5665_v29 = vmax.f32 %v3698_v45, %v2517_v27  ;;  %v2476_v30 = vpop.f32.mrf.mxu0 }
 0x135   :  { %v2519_v31 = vpop.f32.mrf.mxu1  ;;  %v5667_v32 = vmax.f32 %v3697_v48, %v2476_v30 }
 0x136   :  { %v5669_v33 = vmax.f32 %v3699_v49, %v2519_v31  ;;  %v2478_v34 = vpop.f32.mrf.mxu0 }
 0x137   :  { %v2521_v35 = vpop.f32.mrf.mxu1  ;;  %v5671_v36 = vmax.f32 %v3708_v1, %v2478_v34 }
 0x138   :  { %v5673_v37 = vmax.f32 %v3710_v52, %v2521_v35  ;;  %v2480_v38 = vpop.f32.mrf.mxu0 }
 0x139   :  { %v2523_v39 = vpop.f32.mrf.mxu1  ;;  %v5675_v40 = vmax.f32 %v3709_v55, %v2480_v38 }
 0x13a   :  { %v5677_v41 = vmax.f32 %v3711_v56, %v2523_v39  ;;  %v2560_v42 = vpop.f32.mrf.mxu0 }
 0x13b   :  { %v2603_v43 = vpop.f32.mrf.mxu1  ;;  %v5679_v44 = vmax.f32 %v3700_v59, %v2560_v42 }
 0x13c   :  { %6131 = vst [vmem:[#allocation2_spill] sm:$0xff] %v5677_v41  ;;  %v5681_v45 = vmax.f32 %v3702_v60, %v2603_v43  ;;  %v2562_v46 = vpop.f32.mrf.mxu0 }
 0x13d   :  { %6132 = vst [vmem:[#allocation3_spill] sm:$0xff] %v5679_v44  ;;  %v2605_v47 = vpop.f32.mrf.mxu1  ;;  %v5683_v48 = vmax.f32 %v3701_v62, %v2562_v46 }
 0x13e   :  { %6133 = vst [vmem:[#allocation4_spill] sm:$0xff] %v5681_v45  ;;  %v5685_v49 = vmax.f32 %v3703_v63, %v2605_v47  ;;  %v2564_v50 = vpop.f32.mrf.mxu0 }
 0x13f   :  { %6134 = vst [vmem:[#allocation5_spill] sm:$0xff] %v5683_v48  ;;  %v2607_v51 = vpop.f32.mrf.mxu1  ;;  %v5687_v1 = vmax.f32 %v3712_v3, %v2564_v50 }
 0x140   :  { %6135 = vst [vmem:[#allocation6_spill] sm:$0xff] %v5685_v49  ;;  %v5689_v52 = vmax.f32 %v3714_v4, %v2607_v51  ;;  %v2566_v53 = vpop.f32.mrf.mxu0 }
 0x141   :  { %6136 = vst [vmem:[#allocation7_spill] sm:$0xff] %v5687_v1  ;;  %v2609_v54 = vpop.f32.mrf.mxu1  ;;  %v5691_v55 = vmax.f32 %v3713_v7, %v2566_v53 }
 0x142   :  { %6137 = vst [vmem:[#allocation8_spill] sm:$0xff] %v5689_v52  ;;  %v5693_v56 = vmax.f32 %v3715_v8, %v2609_v54  ;;  %v5695_v57 = vpop.f32.mrf.mxu0 }
 0x143   :  { %6138 = vst [vmem:[#allocation9_spill] sm:$0xff] %v5691_v55  ;;  %v5697_v58 = vpop.f32.mrf.mxu1 }
 0x144   :  { %6139 = vst [vmem:[#allocation10_spill] sm:$0xff] %v5693_v56  ;;  %v5703_v61 = vpop.f32.mrf.mxu0 }
 0x145   :  { %v5705_v19 = vpop.f32.mrf.mxu1 }
 0x146   :  { %v5711_v0 = vpop.f32.mrf.mxu0 }
 0x147   :  { %v5713_v2 = vpop.f32.mrf.mxu1 }
 0x148   :  { %v5719_v5 = vpop.f32.mrf.mxu0 }
 0x149   :  { %v5721_v6 = vpop.f32.mrf.mxu1 }
 0x14a   :  { %v5727_v10 = vpop.f32.mrf.mxu0 }
 0x14b   :  { %v5729_v11 = vpop.f32.mrf.mxu1 }
 0x14c   :  { %v5735_v17 = vpop.f32.mrf.mxu0 }
 0x14d   :  { %v5737_v18 = vpop.f32.mrf.mxu1 }
 0x14e   :  { %v5743_v26 = vpop.f32.mrf.mxu0 }
 0x14f   :  { %v5745_v27 = vpop.f32.mrf.mxu1 }
 0x150   :  { %v5751_v34 = vpop.f32.mrf.mxu0 }
 0x151   :  { %6140 = vst [vmem:[#allocation11_spill] sm:$0xff] %v5751_v34  ;;  %v5753_v35 = vpop.f32.mrf.mxu1 }
 0x152   :  { %6141 = vst [vmem:[#allocation12_spill] sm:$0xff] %v5753_v35  ;;  %v5759_v42 = vpop.f32.mrf.mxu0 }
 0x153   :  { %6142 = vst [vmem:[#allocation13_spill] sm:$0xff] %v5759_v42  ;;  %v5761_v43 = vpop.f32.mrf.mxu1 }
 0x154   :  { %6143 = vst [vmem:[#allocation14_spill] sm:$0xff] %v5761_v43  ;;  %v5767_v50 = vpop.f32.mrf.mxu0 }
 0x155   :  { %6144 = vst [vmem:[#allocation15_spill] sm:$0xff] %v5767_v50  ;;  %v5769_v51 = vpop.f32.mrf.mxu1 }
 0x156   :  { %6145 = vst [vmem:[#allocation16_spill] sm:$0xff] %v5769_v51  ;;  %v5775_v39 = vpop.f32.mrf.mxu0 }
 0x157   :  { %6146 = vst [vmem:[#allocation17_spill] sm:$0xff] %v5775_v39  ;;  %v5777_v38 = vpop.f32.mrf.mxu1 }
 0x158   :  { %6147 = vst [vmem:[#allocation18_spill] sm:$0xff] %v5777_v38  ;;  %v5783_v31 = vpop.f32.mrf.mxu0 }
 0x159   :  { %6148 = vst [vmem:[#allocation19_spill] sm:$0xff] %v5783_v31  ;;  %v5785_v30 = vpop.f32.mrf.mxu1 }
 0x15a   :  { %6149 = vst [vmem:[#allocation20_spill] sm:$0xff] %v5785_v30  ;;  %v2904_v23 = vpop.f32.mrf.mxu0 }
 0x15b   :  { %v2947_v22 = vpop.f32.mrf.mxu1 }
 0x15c   :  { %v2906_v9 = vpop.f32.mrf.mxu0 }
 0x15d   :  { %v2949_v14 = vpop.f32.mrf.mxu1 }
 0x15e   :  { %v2908_v8 = vpop.f32.mrf.mxu0 }
 0x15f   :  { %v2951_v7 = vpop.f32.mrf.mxu1 }
 0x160   :  { %v2910_v46 = vpop.f32.mrf.mxu0 }
 0x161   :  { %v2953_v4 = vpop.f32.mrf.mxu1 }
 0x162   :  { %v2990_v3 = vpop.f32.mrf.mxu0 }
 0x163   :  { %v3033_v47 = vpop.f32.mrf.mxu1 }
 0x164   :  { %v2992_v63 = vpop.f32.mrf.mxu0 }
 0x165   :  { %v3035_v62 = vpop.f32.mrf.mxu1 }
 0x166   :  { %v2994_v60 = vpop.f32.mrf.mxu0 }
 0x167   :  { %v3037_v59 = vpop.f32.mrf.mxu1 }
 0x168   :  { %v2996_v38 = vpop.f32.mrf.mxu0 }
 0x169   :  { %v3039_v52 = vpop.f32.mrf.mxu1 }
 0x16a   :  { %v3076_v53 = vpop.f32.mrf.mxu0 }
 0x16b   :  { %v3119_v31 = vpop.f32.mrf.mxu1 }
 0x16c   :  { %v3078_v55 = vpop.f32.mrf.mxu0 }
 0x16d   :  { %v3121_v54 = vpop.f32.mrf.mxu1 }
 0x16e   :  { %v3080_v30 = vpop.f32.mrf.mxu0 }
 0x16f   :  { %v3123_v56 = vpop.f32.mrf.mxu1 }
 0x170   :  { %v3082_v39 = vpop.f32.mrf.mxu0 }
 0x171   :  { %v3125_v1 = vpop.f32.mrf.mxu1 }
 0x172   :  { %v5791_v51 = vpop.f32.mrf.mxu0 }
 0x173   :  { %6150 = vst [vmem:[#allocation21_spill] sm:$0xff] %v5791_v51  ;;  %v5793_v49 = vpop.f32.mrf.mxu1 }
 0x174   :  { %6151 = vst [vmem:[#allocation22_spill] sm:$0xff] %v5793_v49  ;;  %v5795_v50 = vpop.f32.mrf.mxu0 }
 0x175   :  { %6152 = vst [vmem:[#allocation23_spill] sm:$0xff] %v5795_v50  ;;  %v5797_v48 = vpop.f32.mrf.mxu1 }
 0x176   :  { %6153 = vst [vmem:[#allocation24_spill] sm:$0xff] %v5797_v48  ;;  %v5799_v43 = vpop.f32.mrf.mxu0 }
 0x177   :  { %6154 = vst [vmem:[#allocation25_spill] sm:$0xff] %v5799_v43  ;;  %v5801_v45 = vpop.f32.mrf.mxu1 }
 0x178   :  { %6155 = vst [vmem:[#allocation26_spill] sm:$0xff] %v5801_v45  ;;  %v5803_v42 = vpop.f32.mrf.mxu0 }
 0x179   :  { %6156 = vst [vmem:[#allocation27_spill] sm:$0xff] %v5803_v42  ;;  %v5805_v44 = vpop.f32.mrf.mxu1  ;;  %v6166_v42 = vmax.f32 %v5647_v12, %v5695_v57 }
 0x17a   :  { %6157 = vst [vmem:[#allocation28_spill] sm:$0xff] %v5805_v44  ;;  %v5807_v35 = vpop.f32.mrf.mxu0 }
 0x17b   :  { %6158 = vst [vmem:[#allocation29_spill] sm:$0xff] %v5807_v35  ;;  %v5809_v41 = vpop.f32.mrf.mxu1  ;;  %v3764_v44 = vmax.f32 %v6166_v42, %v2904_v23  ;;  %v6167_v35 = vmax.f32 %v5649_v13, %v5697_v58  ;;  %v6171_v13 = vmax.f32 %v5657_v21, %v5713_v2  ;;  %v6175_v21 = vmax.f32 %v5665_v29, %v5729_v11  ;;  %v6194_v23 = vld [vmem:[#allocation6_spill] sm:$0xff] }
 0x17c   :  { %6159 = vst [vmem:[#allocation30_spill] sm:$0xff] %v5809_v41  ;;  %v5811_v34 = vpop.f32.mrf.mxu0 }
 0x17d   :  { %6160 = vst [vmem:[#allocation31_spill] sm:$0xff] %v5811_v34  ;;  %v5813_v51 = vpop.f32.mrf.mxu1  ;;  %v3766_v41 = vmax.f32 %v6167_v35, %v2947_v22  ;;  %v6168_v34 = vmax.f32 %v5651_v15, %v5703_v61  ;;  %v5847_v57 = vmax.f32 %v6171_v13, %v2951_v7  ;;  %v6172_v15 = vmax.f32 %v5659_v24, %v5719_v5  ;;  %v6198_v35 = vld [vmem:[#allocation17_spill] sm:$0xff] }
 0x17e   :  { %6161 = vst [vmem:[#allocation32_spill] sm:$0xff] %v5813_v51  ;;  %v5815_v49 = vpop.f32.mrf.mxu0  ;;  %v5867_v61 = vmax.f32 %v6175_v21, %v3033_v47  ;;  %v6176_v24 = vmax.f32 %v5667_v32, %v5735_v17  ;;  %v6191_v17 = vld [vmem:[#allocation5_spill] sm:$0xff] }
 0x17f   :  { %6162 = vst [vmem:[#allocation33_spill] sm:$0xff] %v5815_v49  ;;  %v5817_v50 = vpop.f32.mrf.mxu1  ;;  %v3765_v51 = vmax.f32 %v6168_v34, %v2906_v9  ;;  %v6169_v49 = vmax.f32 %v5653_v16, %v5705_v19  ;;  %v5852_v58 = vmax.f32 %v6172_v15, %v2910_v46  ;;  %v6173_v16 = vmax.f32 %v5661_v25, %v5721_v6  ;;  %v6183_v6 = vld [vmem:[#allocation12_spill] sm:$0xff]  ;;  %v6189_v9 = vld [vmem:[#allocation14_spill] sm:$0xff]  ;;  %v6197_v34 = vld [vmem:[#allocation7_spill] sm:$0xff] }
 0x180   :  { %6163 = vst [vmem:[#allocation34_spill] sm:$0xff] %v5817_v50  ;;  %v5819_v48 = vpop.f32.mrf.mxu0  ;;  %v5872_v19 = vmax.f32 %v6176_v24, %v2992_v63  ;;  %v6177_v25 = vmax.f32 %v5669_v33, %v5737_v18  ;;  %v6180_v63 = vld [vmem:[#allocation11_spill] sm:$0xff]  ;;  %v6207_v24 = vld [vmem:[#allocation20_spill] sm:$0xff] }
 0x181   :  { %6164 = vst [vmem:[#allocation35_spill] sm:$0xff] %v5819_v48  ;;  %v5821_v43 = vpop.f32.mrf.mxu1  ;;  %v3767_v50 = vmax.f32 %v6169_v49, %v2949_v14  ;;  %v6170_v48 = vmax.f32 %v5655_v20, %v5711_v0  ;;  %v5857_v20 = vmax.f32 %v6173_v16, %v2953_v4  ;;  %v6179_v4 = vmax.f32 %v5673_v37, %v5745_v27  ;;  %v6188_v14 = vld [vmem:[#allocation4_spill] sm:$0xff]  ;;  %v6192_v18 = vld [vmem:[#allocation15_spill] sm:$0xff] }
 0x182   :  { %6165 = vst [vmem:[#allocation36_spill] sm:$0xff] %v5821_v43  ;;  %v5840_v45 = vpop.f32.mrf.mxu0  ;;  %v5877_v0 = vmax.f32 %v6177_v25, %v3035_v62  ;;  %v6181_v5 = vmax.f32 %v5675_v40, %v6180_v63  ;;  %v6182_v62 = vld [vmem:[#allocation2_spill] sm:$0xff]  ;;  %v6190_v37 = vmax.f32 %v6188_v14, %v6189_v9  ;;  %v6193_v40 = vmax.f32 %v6191_v17, %v6192_v18  ;;  %v6204_v16 = vld [vmem:[#allocation19_spill] sm:$0xff]  ;;  %v6217_v17 = vld [vmem:[#allocation29_spill] sm:$0xff] }
 0x183   :  { %v5838_v43 = vmax.f32 %v6170_v48, %v2908_v8  ;;  %v5842_v12 = vpop.f32.mrf.mxu1  ;;  %v6174_v48 = vmax.f32 %v5663_v28, %v5727_v10  ;;  %v6178_v28 = vmax.f32 %v5671_v36, %v5743_v26  ;;  %v5891_v32 = vmax.f32 %v6179_v4, %v3037_v59  ;;  %v6186_v8 = vld [vmem:[#allocation13_spill] sm:$0xff]  ;;  %v6195_v26 = vld [vmem:[#allocation16_spill] sm:$0xff]  ;;  %v6210_v63 = vld [vmem:[#allocation22_spill] sm:$0xff] }
 0x184   :  { %v5896_v33 = vmax.f32 %v6181_v5, %v2996_v38  ;;  %v6184_v7 = vmax.f32 %v6182_v62, %v6183_v6  ;;  %v5911_v59 = vmax.f32 %v6190_v37, %v3119_v31  ;;  %v5916_v22 = vmax.f32 %v6193_v40, %v3078_v55  ;;  %v6200_v31 = vld [vmem:[#allocation8_spill] sm:$0xff]  ;;  %v6203_v55 = vld [vmem:[#allocation9_spill] sm:$0xff]  ;;  %v6211_v62 = vld [vmem:[#allocation23_spill] sm:$0xff] }
 0x185   :  { %v5862_v49 = vmax.f32 %v6174_v48, %v2990_v3  ;;  %v5882_v2 = vmax.f32 %v6178_v28, %v2994_v60  ;;  %v5884_v3 = vpop.f32.mrf.mxu0  ;;  %v5886_v29 = vpop.f32.mrf.mxu1  ;;  %v6185_v60 = vld [vmem:[#allocation3_spill] sm:$0xff]  ;;  %v6196_v27 = vmax.f32 %v6194_v23, %v6195_v26  ;;  %v6199_v38 = vmax.f32 %v6197_v34, %v6198_v35  ;;  %v6214_v14 = vld [vmem:[#allocation26_spill] sm:$0xff]  ;;  %v6220_v26 = vld [vmem:[#allocation32_spill] sm:$0xff] }
 0x186   :  { %v5901_v36 = vmax.f32 %v6184_v7, %v3039_v52  ;;  %v6187_v10 = vmax.f32 %v6185_v60, %v6186_v8  ;;  %v6205_v48 = vmax.f32 %v6203_v55, %v6204_v16  ;;  %v3790_v5 = vmax.f32 %v3766_v41, %v6210_v63  ;;  %v6212_v7 = vld [vmem:[#allocation24_spill] sm:$0xff]  ;;  %v6218_v18 = vld [vmem:[#allocation30_spill] sm:$0xff]  ;;  %v6219_v40 = vld [vmem:[#allocation31_spill] sm:$0xff] }
 0x187   :  { %v5921_v52 = vmax.f32 %v6196_v27, %v3121_v54  ;;  %v5926_v42 = vmax.f32 %v6199_v38, %v3080_v30  ;;  %v5928_v46 = vpop.f32.mrf.mxu0  ;;  %v5930_v47 = vpop.f32.mrf.mxu1  ;;  %v6206_v54 = vld [vmem:[#allocation10_spill] sm:$0xff]  ;;  %v6209_v30 = vld [vmem:[#allocation21_spill] sm:$0xff]  ;;  %v3789_v6 = vmax.f32 %v3765_v51, %v6211_v62  ;;  %v3791_v60 = vmax.f32 %v3767_v50, %v6212_v7 }
 0x188   :  { %v5906_v11 = vmax.f32 %v6187_v10, %v3076_v53  ;;  %v6201_v53 = vld [vmem:[#allocation18_spill] sm:$0xff]  ;;  %v5940_v21 = vmax.f32 %v6205_v48, %v3082_v39  ;;  %v6208_v25 = vmax.f32 %v6206_v54, %v6207_v24  ;;  %v3788_v4 = vmax.f32 %v3764_v44, %v6209_v30  ;;  %v6216_v44 = vld [vmem:[#allocation28_spill] sm:$0xff]  ;;  %v5965_v50 = vpop.permute.xlu0 %3840  ;;  %v6221_v27 = vld [vmem:[#allocation33_spill] sm:$0xff] }
 0x189   :  { %v6202_v13 = vmax.f32 %v6200_v31, %v6201_v53  ;;  %v5953_v10 = vpop.f32.mrf.mxu0  ;;  %v5955_v39 = vpop.f32.mrf.mxu1  ;;  %v3802_v9 = vmax.f32 %v5847_v57, %v6214_v14  ;;  %v3803_v41 = vmax.f32 %v5857_v20, %v6216_v44  ;;  %v3792_v51 = vmax.f32 %v5862_v49, %v6217_v17  ;;  %v6222_v20 = vld [vmem:[#allocation34_spill] sm:$0xff]  ;;  %v6223_v49 = vld [vmem:[#allocation35_spill] sm:$0xff]  ;;  %v6224_v55 = vld [vmem:[#allocation36_spill] sm:$0xff] }
 0x18a   :  { %v5945_v28 = vmax.f32 %v6208_v25, %v3125_v1  ;;  %v6215_v1 = vld [vmem:[#allocation27_spill] sm:$0xff]  ;;  %v3793_v23 = vmax.f32 %v5872_v19, %v6219_v40  ;;  %v6227_v40 = vmax.f32 %v5891_v32, %v6222_v20 }
 0x18b   :  { %v5935_v15 = vmax.f32 %v6202_v13, %v3123_v56  ;;  %v6213_v56 = vld [vmem:[#allocation25_spill] sm:$0xff]  ;;  %v3801_v37 = vmax.f32 %v5852_v58, %v6215_v1  ;;  %v3420_v34 = vpop.f32.mrf.mxu0  ;;  %v3463_v35 = vpop.f32.mrf.mxu1 }
 0x18c   :  { %v3800_v8 = vmax.f32 %v5838_v43, %v6213_v56  ;;  %v3794_v43 = vmax.f32 %v5867_v61, %v6218_v18  ;;  %v3812_v53 = vmax.f32 %v3788_v4, %v3420_v34  ;;  %v3814_v13 = vmax.f32 %v3790_v5, %v3463_v35  ;;  %v5999_v35 = vpop.permute.xlu0 %3845 }
 0x18d   :  { %v3422_v25 = vpop.f32.mrf.mxu0  ;;  %v3465_v30 = vpop.f32.mrf.mxu1  ;;  %v6225_v61 = vmax.f32 %v5877_v0, %v6220_v26  ;;  %v6228_v26 = vmax.f32 %v5896_v33, %v6223_v49 }
 0x18e   :  { %v3813_v63 = vmax.f32 %v3789_v6, %v3422_v25  ;;  %v3848_v62 = vadd.f32 %v5965_v50, %v3812_v53  ;;  %v3815_v7 = vmax.f32 %v3791_v60, %v3465_v30  ;;  %v3850_v4 = vadd.f32 %v5965_v50, %v3814_v13 }
 0x18f   :  { %v3424_v44 = vpop.f32.mrf.mxu0  ;;  %v3467_v17 = vpop.f32.mrf.mxu1 }
 0x190   :  { %v3849_v6 = vadd.f32 %v5965_v50, %v3813_v63  ;;  %vm3872_vm1 = vcmp.ge.f32.partialorder %v3848_v62, 0.0  ;;  %v3896_v60 = vmul.f32 0.1, %v3848_v62  ;;  %v3851_v34 = vadd.f32 %v5965_v50, %v3815_v7 }
 0x191   :  { %vm3874_vm2 = vcmp.ge.f32.partialorder %v3850_v4, 0.0  ;;  %v3898_v53 = vmul.f32 0.1, %v3850_v4  ;;  %v3824_v13 = vmax.f32 %v3800_v8, %v3424_v44  ;;  %v3826_v25 = vmax.f32 %v3802_v9, %v3467_v17  ;;  %v3426_v30 = vpop.f32.mrf.mxu0  ;;  %v3469_v56 = vpop.f32.mrf.mxu1 }
 0x192   :  { %vm3873_vm3 = vcmp.ge.f32.partialorder %v3849_v6, 0.0  ;;  %v3897_v14 = vmul.f32 0.1, %v3849_v6  ;;  %v3920_v5 = vsel %vm3872_vm1, %v3848_v62, %v3896_v60  ;;  %vm3875_vm4 = vcmp.ge.f32.partialorder %v3851_v34, 0.0 }
 0x193   :  { %v3899_v1 = vmul.f32 0.1, %v3851_v34  ;;  %v3922_v24 = vsel %vm3874_vm2, %v3850_v4, %v3898_v53  ;;  %v3825_v54 = vmax.f32 %v3801_v37, %v3426_v30  ;;  %v3860_v63 = vadd.f32 %v5999_v35, %v3824_v13  ;;  %v3506_v48 = vpop.f32.mrf.mxu0  ;;  %v3549_v16 = vpop.f32.mrf.mxu1 }
 0x194   :  { %v3921_v7 = vsel %vm3873_vm3, %v3849_v6, %v3897_v14  ;;  %v3827_v31 = vmax.f32 %v3803_v41, %v3469_v56  ;;  %v3862_v38 = vadd.f32 %v5999_v35, %v3826_v25  ;;  %v3816_v58 = vmax.f32 %v3792_v51, %v3506_v48 }
 0x195   :  { %v4315_v8 = vpack.c.bf16 %v3921_v7, %v3920_v5  ;;  %v3923_v9 = vsel %vm3875_vm4, %v3851_v34, %v3899_v1  ;;  %v3861_v44 = vadd.f32 %v5999_v35, %v3825_v54  ;;  %vm3884_vm5 = vcmp.ge.f32.partialorder %v3860_v63, 0.0  ;;  %v3508_v17 = vpop.f32.mrf.mxu0  ;;  %v3551_v62 = vpop.f32.mrf.mxu1 }
 0x196   :  { %v4316_v60 = vpack.c.bf16 %v3923_v9, %v3922_v24  ;;  %v3908_v57 = vmul.f32 0.1, %v3860_v63  ;;  %v3863_v37 = vadd.f32 %v5999_v35, %v3827_v31  ;;  %vm3886_vm6 = vcmp.ge.f32.partialorder %v3862_v38, 0.0 }
 0x197   :  { %4016 = vst [vmem:[%s6104_s3] sm:$0xff] %v4315_v8  ;;  %vm3885_vm7 = vcmp.ge.f32.partialorder %v3861_v44, 0.0  ;;  %v3909_v41 = vmul.f32 0.1, %v3861_v44  ;;  %v3910_v4 = vmul.f32 0.1, %v3862_v38  ;;  %v3852_v51 = vadd.f32 %v5965_v50, %v3816_v58  ;;  %v3510_v48 = vpop.f32.mrf.mxu0  ;;  %v3553_v5 = vpop.f32.mrf.mxu1 }
 0x198   :  { %4017 = vst [vmem:[%s6104_s3 + $0x8] sm:$0xff] %v4316_v60  ;;  %v3932_v54 = vsel %vm3884_vm5, %v3860_v63, %v3908_v57  ;;  %vm3887_vm8 = vcmp.ge.f32.partialorder %v3863_v37, 0.0  ;;  %v3911_v24 = vmul.f32 0.1, %v3863_v37  ;;  %v3818_v31 = vmax.f32 %v3794_v43, %v3549_v16 }
 0x199   :  { %v3933_v56 = vsel %vm3885_vm7, %v3861_v44, %v3909_v41  ;;  %v3934_v14 = vsel %vm3886_vm6, %v3862_v38, %v3910_v4  ;;  %vm3876_vm9 = vcmp.ge.f32.partialorder %v3852_v51, 0.0  ;;  %v3900_v1 = vmul.f32 0.1, %v3852_v51  ;;  %v3512_v6 = vpop.f32.mrf.mxu0  ;;  %v3555_v34 = vpop.f32.mrf.mxu1 }
 0x19a   :  { %v4321_v58 = vpack.c.bf16 %v3933_v56, %v3932_v54  ;;  %v3935_v53 = vsel %vm3887_vm8, %v3863_v37, %v3911_v24  ;;  %v3854_v13 = vadd.f32 %v5965_v50, %v3818_v31  ;;  %v3817_v57 = vmax.f32 %v3793_v23, %v3508_v17 }
 0x19b   :  { %v4322_v25 = vpack.c.bf16 %v3935_v53, %v3934_v14  ;;  %v3924_v30 = vsel %vm3876_vm9, %v3852_v51, %v3900_v1  ;;  %v3819_v18 = vmax.f32 %v6225_v61, %v3551_v62  ;;  %v6226_v43 = vmax.f32 %v5882_v2, %v6221_v27  ;;  %v3592_v16 = vpop.f32.mrf.mxu0  ;;  %v3635_v7 = vpop.f32.mrf.mxu1 }
 0x19c   :  { %4022 = vst [vmem:[%s6104_s3 + $0x30] sm:$0xff] %v4321_v58  ;;  %vm3878_vm10 = vcmp.ge.f32.partialorder %v3854_v13, 0.0  ;;  %v3902_v63 = vmul.f32 0.1, %v3854_v13  ;;  %v3853_v19 = vadd.f32 %v5965_v50, %v3817_v57  ;;  %v3830_v23 = vmax.f32 %v6227_v40, %v3553_v5 }
 0x19d   :  { %v3828_v38 = vmax.f32 %v6226_v43, %v3510_v48  ;;  %4023 = vst [vmem:[%s6104_s3 + $0x38] sm:$0xff] %v4322_v25  ;;  %v3855_v0 = vadd.f32 %v5965_v50, %v3819_v18  ;;  %v3829_v27 = vmax.f32 %v6228_v26, %v3512_v6  ;;  %v6229_v8 = vmax.f32 %v5901_v36, %v6224_v55  ;;  %v3594_v44 = vpop.f32.mrf.mxu0  ;;  %v3637_v49 = vpop.f32.mrf.mxu1 }
 0x19e   :  { %v3926_v32 = vsel %vm3878_vm10, %v3854_v13, %v3902_v63  ;;  %vm3877_vm11 = vcmp.ge.f32.partialorder %v3853_v19, 0.0  ;;  %v3901_v20 = vmul.f32 0.1, %v3853_v19  ;;  %v3866_v17 = vadd.f32 %v5999_v35, %v3830_v23 }
 0x19f   :  { %v3864_v2 = vadd.f32 %v5999_v35, %v3828_v38  ;;  %v3831_v9 = vmax.f32 %v6229_v8, %v3555_v34  ;;  %vm3879_vm12 = vcmp.ge.f32.partialorder %v3855_v0, 0.0  ;;  %v3903_v62 = vmul.f32 0.1, %v3855_v0  ;;  %v3596_v48 = vpop.f32.mrf.mxu0  ;;  %v3639_v25 = vpop.f32.mrf.mxu1 }
 0x1a0   :  { %v3925_v37 = vsel %vm3877_vm11, %v3853_v19, %v3901_v20  ;;  %vm3890_vm14 = vcmp.ge.f32.partialorder %v3866_v17, 0.0  ;;  %v3914_v41 = vmul.f32 0.1, %v3866_v17  ;;  %v3865_v33 = vadd.f32 %v5999_v35, %v3829_v27 }
 0x1a1   :  { %vm3888_vm13 = vcmp.ge.f32.partialorder %v3864_v2, 0.0  ;;  %v3912_v60 = vmul.f32 0.1, %v3864_v2  ;;  %v4317_v4 = vpack.c.bf16 %v3925_v37, %v3924_v30  ;;  %v3927_v51 = vsel %vm3879_vm12, %v3855_v0, %v3903_v62 }
 0x1a2   :  { %v3867_v55 = vadd.f32 %v5999_v35, %v3831_v9  ;;  %v4318_v5 = vpack.c.bf16 %v3927_v51, %v3926_v32  ;;  %v3938_v54 = vsel %vm3890_vm14, %v3866_v17, %v3914_v41  ;;  %vm3889_vm15 = vcmp.ge.f32.partialorder %v3865_v33, 0.0 }
 0x1a3   :  { %v3936_v36 = vsel %vm3888_vm13, %v3864_v2, %v3912_v60  ;;  %v3913_v24 = vmul.f32 0.1, %v3865_v33  ;;  %4018 = vst [vmem:[%s6104_s3 + $0x10] sm:$0xff] %v4317_v4  ;;  %v6230_v56 = vmax.f32 %v5906_v11, %v5840_v45  ;;  %v6231_v1 = vmax.f32 %v5911_v59, %v5842_v12 }
 0x1a4   :  { %vm3891_vm0 = vcmp.ge.f32.partialorder %v3867_v55, 0.0  ;;  %v3915_v31 = vmul.f32 0.1, %v3867_v55  ;;  %4019 = vst [vmem:[%s6104_s3 + $0x18] sm:$0xff] %v4318_v5  ;;  %v6232_v58 = vmax.f32 %v5916_v22, %v5884_v3  ;;  %v6233_v13 = vmax.f32 %v5921_v52, %v5886_v29 }
 0x1a5   :  { %v3820_v14 = vmax.f32 %v6230_v56, %v3592_v16  ;;  %v3822_v6 = vmax.f32 %v6231_v1, %v3635_v7  ;;  %v3937_v34 = vsel %vm3889_vm15, %v3865_v33, %v3913_v24  ;;  %v6234_v45 = vmax.f32 %v5926_v42, %v5928_v46  ;;  %v3598_v42 = vpop.f32.mrf.mxu0 }
 0x1a6   :  { %v3821_v53 = vmax.f32 %v6232_v58, %v3594_v44  ;;  %v3823_v57 = vmax.f32 %v6233_v13, %v3637_v49  ;;  %v4323_v12 = vpack.c.bf16 %v3937_v34, %v3936_v36  ;;  %v3939_v59 = vsel %vm3891_vm0, %v3867_v55, %v3915_v31 }
 0x1a7   :  { %v3832_v11 = vmax.f32 %v6234_v45, %v3596_v48  ;;  %v3856_v30 = vadd.f32 %v5965_v50, %v3820_v14  ;;  %v3858_v61 = vadd.f32 %v5965_v50, %v3822_v6  ;;  %v4324_v18 = vpack.c.bf16 %v3939_v59, %v3938_v54 }
 0x1a8   :  { %v3857_v43 = vadd.f32 %v5965_v50, %v3821_v53  ;;  %v3859_v3 = vadd.f32 %v5965_v50, %v3823_v57  ;;  %4024 = vst [vmem:[%s6104_s3 + $0x40] sm:$0xff] %v4323_v12  ;;  %v3641_v50 = vpop.f32.mrf.mxu1  ;;  %v3811_v16 = vmax.f32 %v5945_v28, %v5955_v39  ;;  %v6235_v7 = vmax.f32 %v5935_v15, %v5930_v47 }
 0x1a9   :  { %v3868_v22 = vadd.f32 %v5999_v35, %v3832_v11  ;;  %vm3880_vm1 = vcmp.ge.f32.partialorder %v3856_v30, 0.0  ;;  %v3904_v29 = vmul.f32 0.1, %v3856_v30  ;;  %vm3882_vm2 = vcmp.ge.f32.partialorder %v3858_v61, 0.0  ;;  %4025 = vst [vmem:[%s6104_s3 + $0x48] sm:$0xff] %v4324_v18 }
 0x1aa   :  { %v3906_v52 = vmul.f32 0.1, %v3858_v61  ;;  %vm3881_vm3 = vcmp.ge.f32.partialorder %v3857_v43, 0.0  ;;  %v3905_v46 = vmul.f32 0.1, %v3857_v43  ;;  %vm3883_vm4 = vcmp.ge.f32.partialorder %v3859_v3, 0.0 }
 0x1ab   :  { %v3907_v38 = vmul.f32 0.1, %v3859_v3  ;;  %v3928_v63 = vsel %vm3880_vm1, %v3856_v30, %v3904_v29  ;;  %v3834_v0 = vmax.f32 %v6235_v7, %v3639_v25  ;;  %v6236_v2 = vmax.f32 %v5940_v21, %v5953_v10 }
 0x1ac   :  { %v3930_v19 = vsel %vm3882_vm2, %v3858_v61, %v3906_v52  ;;  %v3929_v40 = vsel %vm3881_vm3, %v3857_v43, %v3905_v46  ;;  %v3835_v9 = vmax.f32 %v3811_v16, %v3641_v50  ;;  %v3916_v44 = vmul.f32 0.1, %v3868_v22 }
 0x1ad   :  { %v3931_v23 = vsel %vm3883_vm4, %v3859_v3, %v3907_v38  ;;  %v3833_v26 = vmax.f32 %v6236_v2, %v3598_v42  ;;  %v4319_v27 = vpack.c.bf16 %v3929_v40, %v3928_v63  ;;  %v3870_v32 = vadd.f32 %v5999_v35, %v3834_v0 }
 0x1ae   :  { %v4320_v8 = vpack.c.bf16 %v3931_v23, %v3930_v19  ;;  %vm3892_vm5 = vcmp.ge.f32.partialorder %v3868_v22, 0.0  ;;  %v3871_v47 = vadd.f32 %v5999_v35, %v3835_v9 }
 0x1af   :  { %v3869_v28 = vadd.f32 %v5999_v35, %v3833_v26  ;;  %4020 = vst [vmem:[%s6104_s3 + $0x20] sm:$0xff] %v4319_v27  ;;  %vm3894_vm6 = vcmp.ge.f32.partialorder %v3870_v32, 0.0  ;;  %v3918_v15 = vmul.f32 0.1, %v3870_v32  ;;  %v3940_v39 = vsel %vm3892_vm5, %v3868_v22, %v3916_v44 }
 0x1b0   :  { %4021 = vst [vmem:[%s6104_s3 + $0x28] sm:$0xff] %v4320_v8  ;;  %vm3895_vm8 = vcmp.ge.f32.partialorder %v3871_v47, 0.0  ;;  %v3919_v10 = vmul.f32 0.1, %v3871_v47 }
 0x1b1   :  { %vm3893_vm7 = vcmp.ge.f32.partialorder %v3869_v28, 0.0  ;;  %v3917_v21 = vmul.f32 0.1, %v3869_v28  ;;  %v3942_v17 = vsel %vm3894_vm6, %v3870_v32, %v3918_v15 }
 0x1b2   :  { %v3943_v60 = vsel %vm3895_vm8, %v3871_v47, %v3919_v10 }
 0x1b3   :  { %v3941_v20 = vsel %vm3893_vm7, %v3869_v28, %v3917_v21  ;;  %v4326_v37 = vpack.c.bf16 %v3943_v60, %v3942_v17 }
 0x1b4   :  { %v4325_v62 = vpack.c.bf16 %v3941_v20, %v3940_v39 }
 0x1b5   :  { %4027 = vst [vmem:[%s6104_s3 + $0x58] sm:$0xff] %v4326_v37 }
 0x1b6   :  { %4026 = vst [vmem:[%s6104_s3 + $0x50] sm:$0xff] %v4325_v62 }

// kernel: _lambda_.3
= control target key start
LH: loop header
LB: loop body
LE: loop exit
PB: predicated region body
PF: predicated region fallthrough
CT: control target
= control target key end

     0   :  { %v967_v1 = vmov 0   ;;  %vm346_vm0 = vcmask 392192   ;;  %s1195_s0 = inlined_call_operand.vmem [shape: bf16[48,2304], index: 0, kind: input, shape index: {}]   ;;  %s1196_s1 = inlined_call_operand.vmem [shape: bf16[16,48], index: 1, kind: input, shape index: {}]   ;;  %s1197_s2 = inlined_call_operand.vmem [shape: f32[16,1], index: 2, kind: input, shape index: {}]   ;;  %s1198_s3 = inlined_call_operand.vmem [shape: bf16[16,256], index: 3, kind: output, shape index: {}]  }
   0x1   :  { %v885_v0 = vld [vmem:[%s1195_s0 + $0x124] ss:$72 sps:$4 sm:$0xff]   ;;  %382 = vmatprep.mubr.bf16.mxu0 %v967_v1  ;;  %425 = vmatprep.mubr.bf16.mxu1 %v967_v1  ;;  %v889_v3 = vld [vmem:[%s1195_s0 + $0x120] ss:$72 sps:$4 sm:$0xff]   ;;  %v891_v5 = vld [vmem:[%s1195_s0 + $0x94] ss:$72 sps:$4 sm:$0xff]  }
   0x2   :  { %v887_v2 = vld [vmem:[%s1195_s0 + $0x12c] ss:$72 sps:$4 sm:$0xff]   ;;  %884 = vset.pattern.permute.xlu0 %v967_v1  ;;  %360 = vmatprep.subr.bf16.mxu0 %v885_v0  ;;  %v890_v4 = vld [vmem:[%s1195_s0 + $0x128] ss:$72 sps:$4 sm:$0xff]   ;;  %v893_v6 = vld [vmem:[%s1195_s0 + $0x9c] ss:$72 sps:$4 sm:$0xff]  }
   0x3   :  { %403 = vmatprep.subr.bf16.mxu1 %v887_v2  ;;  %361 = vmatpush1.bf16.msra.mxu0 %v889_v3  ;;  %v895_v7 = vld [vmem:[%s1195_s0 + $0x90] ss:$72 sps:$4 sm:$0xff]   ;;  %v897_v9 = vld [vmem:[%s1195_s0 + $0x4] ss:$72 sps:$4 sm:$0xff]   ;;  %v901_v11 = vld [vmem:[%s1195_s0] ss:$72 sps:$4 sm:$0xff]  }
   0x4   :  { %404 = vmatpush1.bf16.msra.mxu1 %v890_v4  ;;  %362 = vmatprep.subr.bf16.mxu0 %v891_v5  ;;  %v896_v8 = vld [vmem:[%s1195_s0 + $0x98] ss:$72 sps:$4 sm:$0xff]   ;;  %v899_v10 = vld [vmem:[%s1195_s0 + $0xc] ss:$72 sps:$4 sm:$0xff]   ;;  %v902_v12 = vld [vmem:[%s1195_s0 + $0x8] ss:$72 sps:$4 sm:$0xff]  }
   0x5   :  { %405 = vmatprep.subr.bf16.mxu1 %v893_v6  ;;  %v906_v13 = vld [vmem:[%s1195_s0 + $0x134] ss:$72 sps:$4 sm:$0xff]   ;;  %v1033_v14 = vld [vmem:[%s1196_s1] sm:$0xff]   ;;  %v904_v16 = vld [vmem:[%s1195_s0 + $0x130] ss:$72 sps:$4 sm:$0xff]  }
   0x6   :  { %v909_v15 = vld [vmem:[%s1195_s0 + $0x13c] ss:$72 sps:$4 sm:$0xff]   ;;  %v907_v17 = vld [vmem:[%s1195_s0 + $0x138] ss:$72 sps:$4 sm:$0xff]   ;;  %v915_v19 = vld [vmem:[%s1195_s0 + $0xac] ss:$72 sps:$4 sm:$0xff]  }
   0x7   :  { %363 = vmatpush1.bf16.msra.mxu0 %v895_v7  ;;  %v912_v18 = vld [vmem:[%s1195_s0 + $0xa4] ss:$72 sps:$4 sm:$0xff]   ;;  %v910_v20 = vld [vmem:[%s1195_s0 + $0xa0] ss:$72 sps:$4 sm:$0xff]   ;;  %v918_v22 = vld [vmem:[%s1195_s0 + $0x14] ss:$72 sps:$4 sm:$0xff]  }
   0x8   :  { %406 = vmatpush1.bf16.msra.mxu1 %v896_v8  ;;  %364 = vmatprep.subr.bf16.mxu0 %v897_v9  ;;  %v913_v21 = vld [vmem:[%s1195_s0 + $0xa8] ss:$72 sps:$4 sm:$0xff]   ;;  %v921_v23 = vld [vmem:[%s1195_s0 + $0x1c] ss:$72 sps:$4 sm:$0xff]   ;;  %v919_v25 = vld [vmem:[%s1195_s0 + $0x18] ss:$72 sps:$4 sm:$0xff]  }
   0x9   :  { %407 = vmatprep.subr.bf16.mxu1 %v899_v10  ;;  %v916_v24 = vld [vmem:[%s1195_s0 + $0x10] ss:$72 sps:$4 sm:$0xff]   ;;  %v924_v26 = vld [vmem:[%s1195_s0 + $0x144] ss:$72 sps:$4 sm:$0xff]   ;;  %v922_v28 = vld [vmem:[%s1195_s0 + $0x140] ss:$72 sps:$4 sm:$0xff]  }
   0xa   :  { %v927_v27 = vld [vmem:[%s1195_s0 + $0x14c] ss:$72 sps:$4 sm:$0xff]   ;;  %v925_v29 = vld [vmem:[%s1195_s0 + $0x148] ss:$72 sps:$4 sm:$0xff]   ;;  %v933_v31 = vld [vmem:[%s1195_s0 + $0xbc] ss:$72 sps:$4 sm:$0xff]  }
   0xb   :  { %365 = vmatpush1.bf16.msra.mxu0 %v901_v11  ;;  %v930_v30 = vld [vmem:[%s1195_s0 + $0xb4] ss:$72 sps:$4 sm:$0xff]   ;;  %v928_v32 = vld [vmem:[%s1195_s0 + $0xb0] ss:$72 sps:$4 sm:$0xff]   ;;  %v936_v34 = vld [vmem:[%s1195_s0 + $0x24] ss:$72 sps:$4 sm:$0xff]  }
   0xc   :  { %408 = vmatpush1.bf16.msra.mxu1 %v902_v12  ;;  %446 = vmatprep.subr.bf16.mxu0 %v906_v13  ;;  %v931_v33 = vld [vmem:[%s1195_s0 + $0xb8] ss:$72 sps:$4 sm:$0xff]   ;;  %v939_v35 = vld [vmem:[%s1195_s0 + $0x2c] ss:$72 sps:$4 sm:$0xff]   ;;  %v937_v37 = vld [vmem:[%s1195_s0 + $0x28] ss:$72 sps:$4 sm:$0xff]  }
   0xd   :  { %489 = vmatprep.subr.bf16.mxu1 %v909_v15  ;;  %v934_v36 = vld [vmem:[%s1195_s0 + $0x20] ss:$72 sps:$4 sm:$0xff]   ;;  %v942_v38 = vld [vmem:[%s1195_s0 + $0x154] ss:$72 sps:$4 sm:$0xff]   ;;  %v940_v40 = vld [vmem:[%s1195_s0 + $0x150] ss:$72 sps:$4 sm:$0xff]  }
   0xe   :  { %870 = vmatmul.mubr.msk.bf16.vlgmr.msra.gmra.mxu0 %vm346_vm0, %v1033_v14  ;;  %v945_v39 = vld [vmem:[%s1195_s0 + $0x15c] ss:$72 sps:$4 sm:$0xff]   ;;  %v943_v41 = vld [vmem:[%s1195_s0 + $0x158] ss:$72 sps:$4 sm:$0xff]   ;;  %v951_v43 = vld [vmem:[%s1195_s0 + $0xcc] ss:$72 sps:$4 sm:$0xff]  }
   0xf   :  { %871 = vmatmul.mubr.msk.bf16.vlgmr.msra.gmra.mxu1 %vm346_vm0, %v1033_v14  ;;  %447 = vmatpush1.bf16.msra.mxu0 %v904_v16  ;;  %v948_v42 = vld [vmem:[%s1195_s0 + $0xc4] ss:$72 sps:$4 sm:$0xff]   ;;  %v946_v45 = vld [vmem:[%s1195_s0 + $0xc0] ss:$72 sps:$4 sm:$0xff]   ;;  %v954_v48 = vld [vmem:[%s1195_s0 + $0x34] ss:$72 sps:$4 sm:$0xff]  }
  0x10   :  { %490 = vmatpush1.bf16.msra.mxu1 %v907_v17  ;;  %448 = vmatprep.subr.bf16.mxu0 %v912_v18  ;;  %v769_v44 = vld [vmem:[%s1197_s2] sm:$0xff]  ;;  %v949_v46 = vld [vmem:[%s1195_s0 + $0xc8] ss:$72 sps:$4 sm:$0xff]   ;;  %v963_v54 = vld [vmem:[%s1195_s0 + $0xd4] ss:$72 sps:$4 sm:$0xff]  }
  0x11   :  { %491 = vmatprep.subr.bf16.mxu1 %v915_v19  ;;  %468 = vmatprep.mubr.bf16.mxu0 %v967_v1  ;;  %v770_v47 = vld [vmem:[%s1197_s2 + $0x8] sm:$0xff]  ;;  %v957_v49 = vld [vmem:[%s1195_s0 + $0x3c] ss:$72 sps:$4 sm:$0xff]   ;;  %v952_v50 = vld [vmem:[%s1195_s0 + $0x30] ss:$72 sps:$4 sm:$0xff]  }
  0x12   :  { %511 = vmatprep.mubr.bf16.mxu1 %v967_v1  ;;  %773 = vperm.xlu0 %884, %v769_v44   ;;  %v955_v51 = vld [vmem:[%s1195_s0 + $0x38] ss:$72 sps:$4 sm:$0xff]   ;;  %v960_v52 = vld [vmem:[%s1195_s0 + $0x164] ss:$72 sps:$4 sm:$0xff]  }
  0x13   :  { %449 = vmatpush1.bf16.msra.mxu0 %v910_v20  ;;  %v958_v53 = vld [vmem:[%s1195_s0 + $0x160] ss:$72 sps:$4 sm:$0xff]   ;;  %v961_v55 = vld [vmem:[%s1195_s0 + $0xd0] ss:$72 sps:$4 sm:$0xff]   ;;  %v966_v56 = vld [vmem:[%s1195_s0 + $0x44] ss:$72 sps:$4 sm:$0xff]  }
  0x14   :  { %492 = vmatpush1.bf16.msra.mxu1 %v913_v21  ;;  %450 = vmatprep.subr.bf16.mxu0 %v918_v22  ;;  %v964_v57 = vld [vmem:[%s1195_s0 + $0x40] ss:$72 sps:$4 sm:$0xff]  }
  0x15   :  { %493 = vmatprep.subr.bf16.mxu1 %v921_v23 }
  0x16   :  { %778 = vperm.xlu0 %884, %v770_v47  }
  0x17   :  { %451 = vmatpush1.bf16.msra.mxu0 %v916_v24 }
  0x18   :  { %494 = vmatpush1.bf16.msra.mxu1 %v919_v25  ;;  %532 = vmatprep.subr.bf16.mxu0 %v924_v26 }
  0x19   :  { %575 = vmatprep.subr.bf16.mxu1 %v927_v27 }
  0x1a   :  { %872 = vmatmul.mubr.msk.bf16.vlgmr.msra.gmra.mxu0 %vm346_vm0, %v1033_v14 }
  0x1b   :  { %873 = vmatmul.mubr.msk.bf16.vlgmr.msra.gmra.mxu1 %vm346_vm0, %v1033_v14  ;;  %533 = vmatpush1.bf16.msra.mxu0 %v922_v28 }
  0x1c   :  { %576 = vmatpush1.bf16.msra.mxu1 %v925_v29  ;;  %534 = vmatprep.subr.bf16.mxu0 %v930_v30 }
  0x1d   :  { %577 = vmatprep.subr.bf16.mxu1 %v933_v31  ;;  %554 = vmatprep.mubr.bf16.mxu0 %v967_v1 }
  0x1e   :  { %597 = vmatprep.mubr.bf16.mxu1 %v967_v1 }
  0x1f   :  { %535 = vmatpush1.bf16.msra.mxu0 %v928_v32 }
  0x20   :  { %578 = vmatpush1.bf16.msra.mxu1 %v931_v33  ;;  %536 = vmatprep.subr.bf16.mxu0 %v936_v34 }
  0x21   :  { %579 = vmatprep.subr.bf16.mxu1 %v939_v35 }
  0x23   :  { %537 = vmatpush1.bf16.msra.mxu0 %v934_v36 }
  0x24   :  { %580 = vmatpush1.bf16.msra.mxu1 %v937_v37  ;;  %618 = vmatprep.subr.bf16.mxu0 %v942_v38 }
  0x25   :  { %661 = vmatprep.subr.bf16.mxu1 %v945_v39 }
  0x26   :  { %874 = vmatmul.mubr.msk.bf16.vlgmr.msra.gmra.mxu0 %vm346_vm0, %v1033_v14 }
  0x27   :  { %875 = vmatmul.mubr.msk.bf16.vlgmr.msra.gmra.mxu1 %vm346_vm0, %v1033_v14  ;;  %619 = vmatpush1.bf16.msra.mxu0 %v940_v40 }
  0x28   :  { %662 = vmatpush1.bf16.msra.mxu1 %v943_v41  ;;  %620 = vmatprep.subr.bf16.mxu0 %v948_v42 }
  0x29   :  { %663 = vmatprep.subr.bf16.mxu1 %v951_v43  ;;  %640 = vmatprep.mubr.bf16.mxu0 %v967_v1 }
  0x2a   :  { %683 = vmatprep.mubr.bf16.mxu1 %v967_v1 }
  0x2b   :  { %621 = vmatpush1.bf16.msra.mxu0 %v946_v45 }
  0x2c   :  { %664 = vmatpush1.bf16.msra.mxu1 %v949_v46  ;;  %622 = vmatprep.subr.bf16.mxu0 %v954_v48 }
  0x2d   :  { %665 = vmatprep.subr.bf16.mxu1 %v957_v49 }
  0x2f   :  { %623 = vmatpush1.bf16.msra.mxu0 %v952_v50 }
  0x30   :  { %666 = vmatpush1.bf16.msra.mxu1 %v955_v51  ;;  %704 = vmatprep.subr.bf16.mxu0 %v960_v52 }
  0x32   :  { %876 = vmatmul.mubr.msk.bf16.vlgmr.msra.gmra.mxu0 %vm346_vm0, %v1033_v14 }
  0x33   :  { %877 = vmatmul.mubr.msk.bf16.vlgmr.msra.gmra.mxu1 %vm346_vm0, %v1033_v14  ;;  %705 = vmatpush1.bf16.msra.mxu0 %v958_v53 }
  0x34   :  { %726 = vmatprep.mubr.bf16.mxu0 %v967_v1  ;;  %706 = vmatprep.subr.bf16.mxu0 %v963_v54 }
  0x37   :  { %707 = vmatpush1.bf16.msra.mxu0 %v961_v55 }
  0x38   :  { %708 = vmatprep.subr.bf16.mxu0 %v966_v56 }
  0x3b   :  { %709 = vmatpush1.bf16.msra.mxu0 %v964_v57 }
  0x3e   :  { %878 = vmatmul.mubr.msk.bf16.vlgmr.msra.gmra.mxu0 %vm346_vm0, %v1033_v14 }
  0x8d   :  { %v774_v49 = vpop.permute.xlu0 %773 }
  0xce   :  { %v384_v58 = vpop.f32.mrf.mxu0 }
  0xcf   :  { %v427_v59 = vpop.f32.mrf.mxu1 }
  0xd0   :  { %v386_v60 = vpop.f32.mrf.mxu0  ;;  %v737_v13 = vmax.f32 %v384_v58, %v427_v59 }
  0xd1   :  { %v429_v61 = vpop.f32.mrf.mxu1 }
  0xd2   :  { %v388_v62 = vpop.f32.mrf.mxu0  ;;  %v738_v16 = vmax.f32 %v386_v60, %v429_v61 }
  0xd3   :  { %v431_v63 = vpop.f32.mrf.mxu1 }
  0xd4   :  { %v390_v0 = vpop.f32.mrf.mxu0  ;;  %v739_v18 = vmax.f32 %v388_v62, %v431_v63 }
  0xd5   :  { %v433_v1 = vpop.f32.mrf.mxu1 }
  0xd6   :  { %v740_v24 = vmax.f32 %v390_v0, %v433_v1  ;;  %v779_v0 = vpop.permute.xlu0 %778 }
  0xda   :  { %v470_v2 = vpop.f32.mrf.mxu0 }
  0xdb   :  { %v513_v3 = vpop.f32.mrf.mxu1  ;;  %v741_v17 = vmax.f32 %v737_v13, %v470_v2 }
  0xdc   :  { %v472_v4 = vpop.f32.mrf.mxu0 }
  0xdd   :  { %v515_v5 = vpop.f32.mrf.mxu1  ;;  %v742_v19 = vmax.f32 %v738_v16, %v472_v4  ;;  %v745_v22 = vmax.f32 %v741_v17, %v513_v3 }
  0xde   :  { %v474_v6 = vpop.f32.mrf.mxu0 }
  0xdf   :  { %v517_v7 = vpop.f32.mrf.mxu1  ;;  %v743_v23 = vmax.f32 %v739_v18, %v474_v6  ;;  %v746_v26 = vmax.f32 %v742_v19, %v515_v5 }
  0xe0   :  { %v476_v8 = vpop.f32.mrf.mxu0 }
  0xe1   :  { %v519_v9 = vpop.f32.mrf.mxu1  ;;  %v744_v29 = vmax.f32 %v740_v24, %v476_v8  ;;  %v747_v31 = vmax.f32 %v743_v23, %v517_v7 }
  0xe3   :  { %v748_v36 = vmax.f32 %v744_v29, %v519_v9 }
  0xe6   :  { %v556_v10 = vpop.f32.mrf.mxu0 }
  0xe7   :  { %v599_v11 = vpop.f32.mrf.mxu1  ;;  %v749_v27 = vmax.f32 %v745_v22, %v556_v10 }
  0xe8   :  { %v558_v12 = vpop.f32.mrf.mxu0 }
  0xe9   :  { %v601_v14 = vpop.f32.mrf.mxu1  ;;  %v750_v32 = vmax.f32 %v746_v26, %v558_v12  ;;  %v753_v34 = vmax.f32 %v749_v27, %v599_v11 }
  0xea   :  { %v560_v15 = vpop.f32.mrf.mxu0 }
  0xeb   :  { %v603_v20 = vpop.f32.mrf.mxu1  ;;  %v751_v35 = vmax.f32 %v747_v31, %v560_v15  ;;  %v754_v38 = vmax.f32 %v750_v32, %v601_v14 }
  0xec   :  { %v562_v21 = vpop.f32.mrf.mxu0 }
  0xed   :  { %v605_v28 = vpop.f32.mrf.mxu1  ;;  %v752_v41 = vmax.f32 %v748_v36, %v562_v21  ;;  %v755_v42 = vmax.f32 %v751_v35, %v603_v20 }
  0xef   :  { %v756_v48 = vmax.f32 %v752_v41, %v605_v28 }
  0xf2   :  { %v642_v25 = vpop.f32.mrf.mxu0 }
  0xf3   :  { %v685_v33 = vpop.f32.mrf.mxu1  ;;  %v757_v39 = vmax.f32 %v753_v34, %v642_v25 }
  0xf4   :  { %v644_v30 = vpop.f32.mrf.mxu0 }
  0xf5   :  { %v687_v40 = vpop.f32.mrf.mxu1  ;;  %v758_v43 = vmax.f32 %v754_v38, %v644_v30  ;;  %v761_v45 = vmax.f32 %v757_v39, %v685_v33 }
  0xf6   :  { %v646_v37 = vpop.f32.mrf.mxu0 }
  0xf7   :  { %v759_v46 = vmax.f32 %v755_v42, %v646_v37  ;;  %v689_v47 = vpop.f32.mrf.mxu1  ;;  %v762_v51 = vmax.f32 %v758_v43, %v687_v40 }
  0xf8   :  { %v648_v44 = vpop.f32.mrf.mxu0 }
  0xf9   :  { %v760_v53 = vmax.f32 %v756_v48, %v648_v44  ;;  %v763_v55 = vmax.f32 %v759_v46, %v689_v47  ;;  %v691_v56 = vpop.f32.mrf.mxu1 }
  0xfb   :  { %v764_v63 = vmax.f32 %v760_v53, %v691_v56 }
  0xfe   :  { %v728_v50 = vpop.f32.mrf.mxu0 }
  0xff   :  { %v765_v52 = vmax.f32 %v761_v45, %v728_v50 }
 0x100   :  { %v730_v54 = vpop.f32.mrf.mxu0 }
 0x101   :  { %v781_v57 = vadd.f32 %v774_v49, %v765_v52  ;;  %v766_v58 = vmax.f32 %v762_v51, %v730_v54 }
 0x102   :  { %v732_v59 = vpop.f32.mrf.mxu0 }
 0x103   :  { %v789_v60 = vmul.f32 0.1, %v781_v57  ;;  %v782_v61 = vadd.f32 %v774_v49, %v766_v58  ;;  %v767_v62 = vmax.f32 %v763_v55, %v732_v59  ;;  %vm785_vm1 = vcmp.ge.f32.partialorder %v781_v57, 0.0 }
 0x104   :  { %v734_v1 = vpop.f32.mrf.mxu0 }
 0x105   :  { %vm786_vm2 = vcmp.ge.f32.partialorder %v782_v61, 0.0  ;;  %v790_v2 = vmul.f32 0.1, %v782_v61  ;;  %v783_v3 = vadd.f32 %v779_v0, %v767_v62  ;;  %v768_v4 = vmax.f32 %v764_v63, %v734_v1 }
 0x106   :  { %v793_v5 = vsel %vm785_vm1, %v781_v57, %v789_v60 }
 0x107   :  { %v794_v6 = vsel %vm786_vm2, %v782_v61, %v790_v2  ;;  %v791_v8 = vmul.f32 0.1, %v783_v3  ;;  %v784_v9 = vadd.f32 %v779_v0, %v768_v4  ;;  %vm787_vm3 = vcmp.ge.f32.partialorder %v783_v3, 0.0 }
 0x108   :  { %v881_v7 = vpack.c.bf16 %v794_v6, %v793_v5 }
 0x109   :  { %vm788_vm4 = vcmp.ge.f32.partialorder %v784_v9, 0.0  ;;  %v792_v10 = vmul.f32 0.1, %v784_v9  ;;  %v795_v11 = vsel %vm787_vm3, %v783_v3, %v791_v8 }
 0x10a   :  { %809 = vst [vmem:[%s1198_s3] sm:$0xff] %v881_v7 }
 0x10b   :  { %v796_v12 = vsel %vm788_vm4, %v784_v9, %v792_v10 }
 0x10c   :  { %v882_v13 = vpack.c.bf16 %v796_v12, %v795_v11 }
 0x10e   :  { %810 = vst [vmem:[%s1198_s3 + $0x8] sm:$0xff] %v882_v13 }

</bundles_post_ra>
